<compile_context>
chip_gen: v6e
topology: v6e:2x2x1
jax: 0.10.0
libtpu: 0.0.40
codegen_flags: <defaults>
</compile_context>

<pallas_src>
import jax
import jax.numpy as jnp
from jax.experimental import pallas as pl
from jax.experimental.pallas import tpu as pltpu


# ---------------------------------------------------------------------------
# Kernel: one grid step = one (TR, F) row slab, whole block fused in VMEM.
#   x_ref  : (TR, F)  native dtype
#   p_ref  : (8, W)   f32 slab: row0=gamma, row1=beta, row2=b2, row3=b1
#   w1_ref : (F, H)   bf16 (pre-transposed to x @ W layout)
#   w2_ref : (H, F)   bf16
#   o_ref  : (TR, F)  same dtype as x
# ---------------------------------------------------------------------------
def _residual_layer_kernel(x_ref, p_ref, w1_ref, w2_ref, o_ref):
    feat = x_ref.shape[-1]
    hidden = w1_ref.shape[-1]

    x = x_ref[...].astype(jnp.float32)                      # (TR, F) f32 math

    # ---- LayerNorm (f32, eps = 1e-5 to match nn.LayerNorm) ----
    mu = jnp.mean(x, axis=-1, keepdims=True)
    var = jnp.mean((x - mu) ** 2, axis=-1, keepdims=True)
    gamma = p_ref[0:1, 0:feat]                               # (1, F)
    beta = p_ref[1:2, 0:feat]                                # (1, F)
    y = (x - mu) * jax.lax.rsqrt(var + 1e-5) * gamma + beta

    # ---- Linear -> ReLU -> Linear (bf16 MXU operands, f32 accumulation) ----
    b2 = p_ref[2:3, 0:feat]                                  # (1, F)
    b1 = p_ref[3:4, 0:hidden]                                # (1, H)
    h = jnp.dot(y.astype(jnp.bfloat16), w1_ref[...],
                preferred_element_type=jnp.float32) + b1
    h = jnp.maximum(h, 0.0)
    z = jnp.dot(h.astype(jnp.bfloat16), w2_ref[...],
                preferred_element_type=jnp.float32) + b2

    # ---- residual add (f32), store in the input dtype ----
    o_ref[...] = (z + x).astype(o_ref.dtype)


# ---------------------------------------------------------------------------
# One-time parameter prep: transpose weights to x @ W layout (bf16), and pack
# gamma / beta / b2 / b1 into a single (8, W) f32 slab (fewer kernel inputs).
# ---------------------------------------------------------------------------
def prepare_params(params):
    gamma = jnp.asarray(params["gamma"], jnp.float32)
    beta = jnp.asarray(params["beta"], jnp.float32)
    b1 = jnp.asarray(params["b1"], jnp.float32)
    b2 = jnp.asarray(params["b2"], jnp.float32)
    feat, hidden = gamma.shape[0], b1.shape[0]
    width = ((max(feat, hidden) + 127) // 128) * 128          # lane-dense slab

    slab = jnp.zeros((8, width), jnp.float32)
    slab = slab.at[0, :feat].set(gamma)
    slab = slab.at[1, :feat].set(beta)
    slab = slab.at[2, :feat].set(b2)
    slab = slab.at[3, :hidden].set(b1)

    return {
        "param_slab": slab,                                    # (8, W) f32
        "w1_t": jnp.asarray(params["w1"]).T.astype(jnp.bfloat16),  # (F, H)
        "w2_t": jnp.asarray(params["w2"]).T.astype(jnp.bfloat16),  # (H, F)
    }


# ---------------------------------------------------------------------------
# Generation-aware row tiling.
# ---------------------------------------------------------------------------
def _cores_per_chip():
    try:
        kind = jax.devices()[0].device_kind.lower().replace(" ", "")
    except Exception:
        return 1
    # Megacore chips (2 TensorCores sharing HBM): v4, v5p, v7x.
    if any(tag in kind for tag in ("v4", "v5p", "v7", "7x")):
        return 2
    return 1  # v5e / v6e: single TensorCore


def _pick_row_tile(n_rows, cores_per_chip):
    if cores_per_chip > 1:
        # >= 2 grid steps per TensorCore so each core's pipeline overlaps DMA
        # with compute, using the largest tile that still allows it.
        for tr in (1024, 512, 256, 128, 64, 32, 16, 8):
            if pl.cdiv(n_rows, tr) >= 2 * cores_per_chip:
                return tr
        return 8
    # Single TensorCore: tiny problems run best as one big step (no pipeline
    # prologue/epilogue); cap at 512 rows so the (TR, H) f32 hidden activation
    # doesn't thrash vregs/VMEM (v5e has a single vector-store slot).
    if n_rows <= 512:
        return ((n_rows + 7) // 8) * 8
    return 512


# ---------------------------------------------------------------------------
# pallas_call builder + wrapper.
# ---------------------------------------------------------------------------
def _build_call(*, n_steps, tr, padded_rows, feat, hidden, slab_w, out_dtype,
                single_buffer_params):
    def const_spec(shape):
        idx = lambda i, _n=len(shape): (0,) * _n
        if single_buffer_params:
            # Grid-invariant input: one VMEM copy is enough (saves a redundant
            # second copy of both weight matrices + prefetch bookkeeping).
            return pl.BlockSpec(shape, idx, pipeline_mode=pl.Buffered(1))
        return pl.BlockSpec(shape, idx)

    return pl.pallas_call(
        _residual_layer_kernel,
        out_shape=jax.ShapeDtypeStruct((padded_rows, feat), out_dtype),
        grid_spec=pltpu.PrefetchScalarGridSpec(
            num_scalar_prefetch=0,
            grid=(n_steps,),
            in_specs=[
                pl.BlockSpec((tr, feat), lambda i: (i, 0)),   # x row slab
                const_spec((8, slab_w)),                      # gamma/beta/b2/b1
                const_spec((feat, hidden)),                   # w1^T (bf16)
                const_spec((hidden, feat)),                   # w2^T (bf16)
            ],
            out_specs=pl.BlockSpec((tr, feat), lambda i: (i, 0)),
        ),
        compiler_params=pltpu.CompilerParams(
            dimension_semantics=("parallel",)),
    )


def residual_layer_forward(x, prepped):
    """x: (..., n_features), float dtype. Returns same shape and dtype."""
    feat = x.shape[-1]
    hidden = prepped["w1_t"].shape[1]
    slab_w = prepped["param_slab"].shape[1]

    # Keep the native dtype: no wrapper-side f32 materialization in HBM.
    x2 = x.reshape(-1, feat)
    n_rows = x2.shape[0]

    tr = _pick_row_tile(n_rows, _cores_per_chip())
    n_steps = pl.cdiv(n_rows, tr)
    padded_rows = n_steps * tr
    if padded_rows != n_rows:
        # Pad ragged row counts so every block satisfies the (8, 128) tiling
        # rule and the pipeline stays uniform; padded rows are dropped below.
        x2 = jnp.pad(x2, ((0, padded_rows - n_rows), (0, 0)))

    args = (x2, prepped["param_slab"], prepped["w1_t"], prepped["w2_t"])
    kwargs = dict(n_steps=n_steps, tr=tr, padded_rows=padded_rows, feat=feat,
                  hidden=hidden, slab_w=slab_w, out_dtype=x.dtype)

    # input_output_aliases={0: 0} would additionally drop the output HBM
    # allocation, but requires the caller to donate x; left to the caller.
    try:
        out = _build_call(single_buffer_params=True, **kwargs)(*args)
    except Exception:
        # Installed Pallas rejects pipeline_mode / pl.Buffered(1): fall back
        # to default double-buffering (identical semantics).
        out = _build_call(single_buffer_params=False, **kwargs)(*args)

    if padded_rows != n_rows:
        out = out[:n_rows]
    return out.reshape(x.shape)


# ---------------------------------------------------------------------------
# Pure-JAX f32 reference (mirrors the PyTorch module exactly).
# ---------------------------------------------------------------------------
def reference_forward(x, params):
    x = x.astype(jnp.float32)
    mu = x.mean(-1, keepdims=True)
    var = ((x - mu) ** 2).mean(-1, keepdims=True)
    y = (x - mu) / jnp.sqrt(var + 1e-5) * params["gamma"] + params["beta"]
    h = jax.nn.relu(y @ params["w1"].T + params["b1"])
    z = h @ params["w2"].T + params["b2"]
    return z + x


# ---------------------------------------------------------------------------
if __name__ == "__main__":
    # Small shapes consistent with the module: batch=2, seq=64, n_features=128
    # (lane-dense), n_hidden=256.
    N, L, F, H = 2, 64, 128, 256

    key = jax.random.PRNGKey(0)
    ks = jax.random.split(key, 7)
    params = {
        "w1": jax.random.normal(ks[0], (H, F), jnp.float32) * 0.05,  # (out, in)
        "b1": jax.random.normal(ks[1], (H,), jnp.float32) * 0.05,
        "w2": jax.random.normal(ks[2], (F, H), jnp.float32) * 0.05,
        "b2": jax.random.normal(ks[3], (F,), jnp.float32) * 0.05,
        "gamma": 1.0 + 0.1 * jax.random.normal(ks[4], (F,), jnp.float32),
        "beta": 0.1 * jax.random.normal(ks[5], (F,), jnp.float32),
    }
    prepped = prepare_params(params)   # one-time: pack slab, transpose, bf16

    # --- f32 input (PyTorch default dtype) ---
    x = jax.random.normal(ks[6], (N, L, F), jnp.float32)
    out = jax.block_until_ready(residual_layer_forward(x, prepped))
    ref = reference_forward(x, params)
    assert out.shape == (N, L, F) and out.dtype == jnp.float32
    # bf16 MXU operands (f32 accumulation) => small deviation vs pure-f32 ref.
    assert jnp.allclose(out, ref, atol=3e-2, rtol=3e-2), "f32 mismatch"

    # --- bf16 input: native-dtype I/O path (half the HBM traffic) ---
    xb = x.astype(jnp.bfloat16)
    outb = jax.block_until_ready(residual_layer_forward(xb, prepped))
    refb = reference_forward(xb, params)
    assert outb.dtype == jnp.bfloat16
    assert jnp.allclose(outb.astype(jnp.float32), refb, atol=1e-1, rtol=1e-1), \
        "bf16 mismatch"

    # --- ragged row count: exercises the pad-to-tile path (74 rows) ---
    xr = x[:, :37, :]
    outr = jax.block_until_ready(residual_layer_forward(xr, prepped))
    refr = reference_forward(xr, params)
    assert outr.shape == xr.shape
    assert jnp.allclose(outr, refr, atol=3e-2, rtol=3e-2), "ragged mismatch"

    print("KERNEL_OK")
</pallas_src>

<mosaic_0001>
module attributes {stable_mosaic.version = 11 : i64} {
  func.func @_residual_layer_kernel(%arg0: i32, %arg1: memref<128x128xf32, #tpu.memory_space<vmem>>, %arg2: memref<8x256xf32, #tpu.memory_space<vmem>>, %arg3: memref<128x256xbf16, #tpu.memory_space<vmem>>, %arg4: memref<256x128xbf16, #tpu.memory_space<vmem>>, %arg5: memref<128x128xf32, #tpu.memory_space<vmem>>) attributes {dimension_semantics = [#tpu.dimension_semantics<parallel>], iteration_bounds = array<i64: 1>, scalar_prefetch = 0 : i64, scratch_operands = 0 : i64, tpu.core_type = #tpu.core_type<tc>, window_params = [{transform_indices = @transform_0, window_bounds = array<i64: 128, 128>}, {pipeline_mode = #tpu.pipeline_mode<synchronous>, transform_indices = @transform_1, window_bounds = array<i64: 8, 256>}, {pipeline_mode = #tpu.pipeline_mode<synchronous>, transform_indices = @transform_2, window_bounds = array<i64: 128, 256>}, {pipeline_mode = #tpu.pipeline_mode<synchronous>, transform_indices = @transform_3, window_bounds = array<i64: 256, 128>}, {transform_indices = @transform_4, window_bounds = array<i64: 128, 128>}]} {
    %c0 = arith.constant 0 : index
    %c0_0 = arith.constant 0 : index
    %0 = vector.load %arg1[%c0, %c0_0] : memref<128x128xf32, #tpu.memory_space<vmem>>, vector<128x128xf32>
    %cst = arith.constant dense<0.000000e+00> : vector<128xf32>
    %1 = vector.multi_reduction <add>, %0, %cst [1] : vector<128x128xf32> to vector<128xf32>
    %2 = vector.shape_cast %1 : vector<128xf32> to vector<128x1xf32>
    %cst_1 = arith.constant 1.280000e+02 : f32
    %3 = vector.broadcast %cst_1 : f32 to vector<128x1xf32>
    %4 = arith.divf %2, %3 : vector<128x1xf32>
    %5 = vector.broadcast %4 : vector<128x1xf32> to vector<128x128xf32>
    %6 = arith.subf %0, %5 : vector<128x128xf32>
    %7 = arith.mulf %6, %6 : vector<128x128xf32>
    %cst_2 = arith.constant dense<0.000000e+00> : vector<128xf32>
    %8 = vector.multi_reduction <add>, %7, %cst_2 [1] : vector<128x128xf32> to vector<128xf32>
    %9 = vector.shape_cast %8 : vector<128xf32> to vector<128x1xf32>
    %cst_3 = arith.constant 1.280000e+02 : f32
    %10 = vector.broadcast %cst_3 : f32 to vector<128x1xf32>
    %11 = arith.divf %9, %10 : vector<128x1xf32>
    %c0_4 = arith.constant 0 : index
    %c0_5 = arith.constant 0 : index
    %12 = vector.load %arg2[%c0_4, %c0_5] : memref<8x256xf32, #tpu.memory_space<vmem>>, vector<1x128xf32>
    %c1 = arith.constant 1 : index
    %c0_6 = arith.constant 0 : index
    %13 = vector.load %arg2[%c1, %c0_6] : memref<8x256xf32, #tpu.memory_space<vmem>>, vector<1x128xf32>
    %14 = vector.broadcast %4 : vector<128x1xf32> to vector<128x128xf32>
    %15 = arith.subf %0, %14 : vector<128x128xf32>
    %cst_7 = arith.constant 9.99999974E-6 : f32
    %16 = vector.broadcast %cst_7 : f32 to vector<128x1xf32>
    %17 = arith.addf %11, %16 : vector<128x1xf32>
    %18 = math.rsqrt %17 : vector<128x1xf32>
    %19 = vector.broadcast %18 : vector<128x1xf32> to vector<128x128xf32>
    %20 = arith.mulf %15, %19 : vector<128x128xf32>
    %21 = vector.broadcast %12 : vector<1x128xf32> to vector<128x128xf32>
    %22 = arith.mulf %20, %21 : vector<128x128xf32>
    %23 = vector.broadcast %13 : vector<1x128xf32> to vector<128x128xf32>
    %24 = arith.addf %22, %23 : vector<128x128xf32>
    %c2 = arith.constant 2 : index
    %c0_8 = arith.constant 0 : index
    %25 = vector.load %arg2[%c2, %c0_8] : memref<8x256xf32, #tpu.memory_space<vmem>>, vector<1x128xf32>
    %c3 = arith.constant 3 : index
    %c0_9 = arith.constant 0 : index
    %26 = vector.load %arg2[%c3, %c0_9] : memref<8x256xf32, #tpu.memory_space<vmem>>, vector<1x256xf32>
    %27 = arith.truncf %24 : vector<128x128xf32> to vector<128x128xbf16>
    %c0_10 = arith.constant 0 : index
    %c0_11 = arith.constant 0 : index
    %28 = vector.load %arg3[%c0_10, %c0_11] : memref<128x256xbf16, #tpu.memory_space<vmem>>, vector<128x256xbf16>
    %cst_12 = arith.constant dense<0.000000e+00> : vector<128x256xf32>
    %29 = tpu.matmul %27, %28, %cst_12 {dimension_numbers = #tpu.dot_dimension_numbers<[1], [0], [0], [1], [0, 0, 1, 1], [], []>} : vector<128x128xbf16>, vector<128x256xbf16>, vector<128x256xf32> -> vector<128x256xf32>
    %30 = vector.broadcast %26 : vector<1x256xf32> to vector<128x256xf32>
    %31 = arith.addf %29, %30 : vector<128x256xf32>
    %cst_13 = arith.constant 0.000000e+00 : f32
    %32 = vector.broadcast %cst_13 : f32 to vector<128x256xf32>
    %33 = arith.maximumf %31, %32 : vector<128x256xf32>
    %34 = arith.truncf %33 : vector<128x256xf32> to vector<128x256xbf16>
    %c0_14 = arith.constant 0 : index
    %c0_15 = arith.constant 0 : index
    %35 = vector.load %arg4[%c0_14, %c0_15] : memref<256x128xbf16, #tpu.memory_space<vmem>>, vector<256x128xbf16>
    %cst_16 = arith.constant dense<0.000000e+00> : vector<128x128xf32>
    %36 = tpu.matmul %34, %35, %cst_16 {dimension_numbers = #tpu.dot_dimension_numbers<[1], [0], [0], [1], [0, 0, 1, 1], [], []>} : vector<128x256xbf16>, vector<256x128xbf16>, vector<128x128xf32> -> vector<128x128xf32>
    %37 = vector.broadcast %25 : vector<1x128xf32> to vector<128x128xf32>
    %38 = arith.addf %36, %37 : vector<128x128xf32>
    %39 = arith.addf %38, %0 : vector<128x128xf32>
    %c0_17 = arith.constant 0 : index
    %c0_18 = arith.constant 0 : index
    %40 = vector.load %arg5[%c0_17, %c0_18] : memref<128x128xf32, #tpu.memory_space<vmem>>, vector<128x128xf32>
    tpu.vector_store %arg5[%c0_17, %c0_18], %39 {strides = array<i32>} : memref<128x128xf32, #tpu.memory_space<vmem>>, vector<128x128xf32>,
    return
  }
  func.func @transform_0(%arg0: i32) -> (i32, i32) {
    %c0_i32 = arith.constant 0 : i32
    %c0_i32_0 = arith.constant 0 : i32
    return %arg0, %c0_i32 : i32, i32
  }
  func.func @transform_1(%arg0: i32) -> (i32, i32) {
    %c0_i32 = arith.constant 0 : i32
    %c0_i32_0 = arith.constant 0 : i32
    %c0_i32_1 = arith.constant 0 : i32
    return %c0_i32, %c0_i32_0 : i32, i32
  }
  func.func @transform_2(%arg0: i32) -> (i32, i32) {
    %c0_i32 = arith.constant 0 : i32
    %c0_i32_0 = arith.constant 0 : i32
    %c0_i32_1 = arith.constant 0 : i32
    return %c0_i32, %c0_i32_0 : i32, i32
  }
  func.func @transform_3(%arg0: i32) -> (i32, i32) {
    %c0_i32 = arith.constant 0 : i32
    %c0_i32_0 = arith.constant 0 : i32
    %c0_i32_1 = arith.constant 0 : i32
    return %c0_i32, %c0_i32_0 : i32, i32
  }
  func.func @transform_4(%arg0: i32) -> (i32, i32) {
    %c0_i32 = arith.constant 0 : i32
    %c0_i32_0 = arith.constant 0 : i32
    return %arg0, %c0_i32 : i32, i32
  }
}

module attributes {stable_mosaic.version = 11 : i64} {
  func.func @_residual_layer_kernel(%arg0: i32, %arg1: memref<128x128xf32, #tpu.memory_space<vmem>>, %arg2: memref<8x256xf32, #tpu.memory_space<vmem>>, %arg3: memref<128x256xbf16, #tpu.memory_space<vmem>>, %arg4: memref<256x128xbf16, #tpu.memory_space<vmem>>, %arg5: memref<128x128xf32, #tpu.memory_space<vmem>>) attributes {dimension_semantics = [#tpu.dimension_semantics<parallel>], iteration_bounds = array<i64: 1>, scalar_prefetch = 0 : i64, scratch_operands = 0 : i64, tpu.core_type = #tpu.core_type<tc>, window_params = [{transform_indices = @transform_0, window_bounds = array<i64: 128, 128>}, {pipeline_mode = #tpu.pipeline_mode<synchronous>, transform_indices = @transform_1, window_bounds = array<i64: 8, 256>}, {pipeline_mode = #tpu.pipeline_mode<synchronous>, transform_indices = @transform_2, window_bounds = array<i64: 128, 256>}, {pipeline_mode = #tpu.pipeline_mode<synchronous>, transform_indices = @transform_3, window_bounds = array<i64: 256, 128>}, {transform_indices = @transform_4, window_bounds = array<i64: 128, 128>}]} {
    %c0 = arith.constant 0 : index
    %c0_0 = arith.constant 0 : index
    %0 = vector.load %arg1[%c0, %c0_0] : memref<128x128xf32, #tpu.memory_space<vmem>>, vector<128x128xf32>
    %cst = arith.constant dense<0.000000e+00> : vector<128xf32>
    %1 = vector.multi_reduction <add>, %0, %cst [1] : vector<128x128xf32> to vector<128xf32>
    %2 = vector.shape_cast %1 : vector<128xf32> to vector<128x1xf32>
    %cst_1 = arith.constant 1.280000e+02 : f32
    %3 = vector.broadcast %cst_1 : f32 to vector<128x1xf32>
    %4 = arith.divf %2, %3 : vector<128x1xf32>
    %5 = vector.broadcast %4 : vector<128x1xf32> to vector<128x128xf32>
    %6 = arith.subf %0, %5 : vector<128x128xf32>
    %7 = arith.mulf %6, %6 : vector<128x128xf32>
    %cst_2 = arith.constant dense<0.000000e+00> : vector<128xf32>
    %8 = vector.multi_reduction <add>, %7, %cst_2 [1] : vector<128x128xf32> to vector<128xf32>
    %9 = vector.shape_cast %8 : vector<128xf32> to vector<128x1xf32>
    %cst_3 = arith.constant 1.280000e+02 : f32
    %10 = vector.broadcast %cst_3 : f32 to vector<128x1xf32>
    %11 = arith.divf %9, %10 : vector<128x1xf32>
    %c0_4 = arith.constant 0 : index
    %c0_5 = arith.constant 0 : index
    %12 = vector.load %arg2[%c0_4, %c0_5] : memref<8x256xf32, #tpu.memory_space<vmem>>, vector<1x128xf32>
    %c1 = arith.constant 1 : index
    %c0_6 = arith.constant 0 : index
    %13 = vector.load %arg2[%c1, %c0_6] : memref<8x256xf32, #tpu.memory_space<vmem>>, vector<1x128xf32>
    %14 = vector.broadcast %4 : vector<128x1xf32> to vector<128x128xf32>
    %15 = arith.subf %0, %14 : vector<128x128xf32>
    %cst_7 = arith.constant 9.99999974E-6 : f32
    %16 = vector.broadcast %cst_7 : f32 to vector<128x1xf32>
    %17 = arith.addf %11, %16 : vector<128x1xf32>
    %18 = math.rsqrt %17 : vector<128x1xf32>
    %19 = vector.broadcast %18 : vector<128x1xf32> to vector<128x128xf32>
    %20 = arith.mulf %15, %19 : vector<128x128xf32>
    %21 = vector.broadcast %12 : vector<1x128xf32> to vector<128x128xf32>
    %22 = arith.mulf %20, %21 : vector<128x128xf32>
    %23 = vector.broadcast %13 : vector<1x128xf32> to vector<128x128xf32>
    %24 = arith.addf %22, %23 : vector<128x128xf32>
    %c2 = arith.constant 2 : index
    %c0_8 = arith.constant 0 : index
    %25 = vector.load %arg2[%c2, %c0_8] : memref<8x256xf32, #tpu.memory_space<vmem>>, vector<1x128xf32>
    %c3 = arith.constant 3 : index
    %c0_9 = arith.constant 0 : index
    %26 = vector.load %arg2[%c3, %c0_9] : memref<8x256xf32, #tpu.memory_space<vmem>>, vector<1x256xf32>
    %27 = arith.truncf %24 : vector<128x128xf32> to vector<128x128xbf16>
    %c0_10 = arith.constant 0 : index
    %c0_11 = arith.constant 0 : index
    %28 = vector.load %arg3[%c0_10, %c0_11] : memref<128x256xbf16, #tpu.memory_space<vmem>>, vector<128x256xbf16>
    %cst_12 = arith.constant dense<0.000000e+00> : vector<128x256xf32>
    %29 = tpu.matmul %27, %28, %cst_12 {dimension_numbers = #tpu.dot_dimension_numbers<[1], [0], [0], [1], [0, 0, 1, 1], [], []>} : vector<128x128xbf16>, vector<128x256xbf16>, vector<128x256xf32> -> vector<128x256xf32>
    %30 = vector.broadcast %26 : vector<1x256xf32> to vector<128x256xf32>
    %31 = arith.addf %29, %30 : vector<128x256xf32>
    %cst_13 = arith.constant 0.000000e+00 : f32
    %32 = vector.broadcast %cst_13 : f32 to vector<128x256xf32>
    %33 = arith.maximumf %31, %32 : vector<128x256xf32>
    %34 = arith.truncf %33 : vector<128x256xf32> to vector<128x256xbf16>
    %c0_14 = arith.constant 0 : index
    %c0_15 = arith.constant 0 : index
    %35 = vector.load %arg4[%c0_14, %c0_15] : memref<256x128xbf16, #tpu.memory_space<vmem>>, vector<256x128xbf16>
    %cst_16 = arith.constant dense<0.000000e+00> : vector<128x128xf32>
    %36 = tpu.matmul %34, %35, %cst_16 {dimension_numbers = #tpu.dot_dimension_numbers<[1], [0], [0], [1], [0, 0, 1, 1], [], []>} : vector<128x256xbf16>, vector<256x128xbf16>, vector<128x128xf32> -> vector<128x128xf32>
    %37 = vector.broadcast %25 : vector<1x128xf32> to vector<128x128xf32>
    %38 = arith.addf %36, %37 : vector<128x128xf32>
    %39 = arith.addf %38, %0 : vector<128x128xf32>
    %c0_17 = arith.constant 0 : index
    %c0_18 = arith.constant 0 : index
    %40 = vector.load %arg5[%c0_17, %c0_18] : memref<128x128xf32, #tpu.memory_space<vmem>>, vector<128x128xf32>
    tpu.vector_store %arg5[%c0_17, %c0_18], %39 {strides = array<i32>} : memref<128x128xf32, #tpu.memory_space<vmem>>, vector<128x128xf32>,
    return
  }
  func.func @transform_0(%arg0: i32) -> (i32, i32) {
    %c0_i32 = arith.constant 0 : i32
    %c0_i32_0 = arith.constant 0 : i32
    return %arg0, %c0_i32 : i32, i32
  }
  func.func @transform_1(%arg0: i32) -> (i32, i32) {
    %c0_i32 = arith.constant 0 : i32
    %c0_i32_0 = arith.constant 0 : i32
    %c0_i32_1 = arith.constant 0 : i32
    return %c0_i32, %c0_i32_0 : i32, i32
  }
  func.func @transform_2(%arg0: i32) -> (i32, i32) {
    %c0_i32 = arith.constant 0 : i32
    %c0_i32_0 = arith.constant 0 : i32
    %c0_i32_1 = arith.constant 0 : i32
    return %c0_i32, %c0_i32_0 : i32, i32
  }
  func.func @transform_3(%arg0: i32) -> (i32, i32) {
    %c0_i32 = arith.constant 0 : i32
    %c0_i32_0 = arith.constant 0 : i32
    %c0_i32_1 = arith.constant 0 : i32
    return %c0_i32, %c0_i32_0 : i32, i32
  }
  func.func @transform_4(%arg0: i32) -> (i32, i32) {
    %c0_i32 = arith.constant 0 : i32
    %c0_i32_0 = arith.constant 0 : i32
    return %arg0, %c0_i32 : i32, i32
  }
}

</mosaic_0001>

<bundles_post_ra>
// kernel: tpu_custom_call.1
= control target key start
LH: loop header
LB: loop body
LE: loop exit
PB: predicated region body
PF: predicated region fallthrough
CT: control target
= control target key end

     0   :  { %9 = vsyncpa [#allocation3], 0  ;;  %s1425_s0 = inlined_call_operand.hbm [shape: f32[128,128], index: 0, kind: input, shape index: {}]   ;;  %s1426_s1 = inlined_call_operand.hbm [shape: f32[8,256], index: 1, kind: input, shape index: {}]   ;;  %s1427_s2 = inlined_call_operand.hbm [shape: bf16[128,256], index: 2, kind: input, shape index: {}]   ;;  %s1428_s3 = inlined_call_operand.hbm [shape: bf16[256,128], index: 3, kind: input, shape index: {}]   ;;  %s1429_s4 = inlined_call_operand.hbm [shape: f32[128,128], index: 4, kind: output, shape index: {}]  }
   0x1   :  { %10 = vsyncpa [#allocation6], 0 }
   0x2   :  { %11 = vsyncpa [#allocation9], 0 }
   0x3   :  { %12 = vsyncpa [#allocation4], 0  ;;  %s1156_s15 = smov [#allocation5]   ;;  %s1157_s17 = smov [#allocation2]  }
   0x4   :  { %s31_s16 = sshll.u32 %s1156_s15, 4  ;;  %s18_s18 = sshll.u32 %s1157_s17, 4  ;;  %s32_s16 = int_to_ptr.vmem [resolvable:$true] %s31_s16  ;;  %s19_s18 = int_to_ptr.vmem [resolvable:$true] %s18_s18 }
   0x5   :  { %s1056_s19 = scalar_lea.vmem %s32_s16, 256  ;;  %p1061_p1 = scmp.lt.s32.totalorder %s32_s16, %s32_s16 }
   0x6   :  { %p1057_p0 = scmp.ne.s32.totalorder %s32_s16, %s1056_s19  ;;  %p1062_p2 = scmp.lt.s32.totalorder %s1056_s19, %s1056_s19 }
   0x8   :  { %p1063_p3 = por %p1062_p2, %p1061_p1 }
   0xa   :  { %p1064_p4 = pnand %p1063_p3, %p1057_p0 }
   0xc   :  { %1067 = shalt.err (!%p1064_p4)
}
   0xd   :  { %34 = dma.hbm_to_vmem [thread:$0]  %s1426_s1, 256, %s32_s16, [#allocation6]  }
   0xe   :  { %s1076_s22 = scalar_lea.vmem %s19_s18, 2048  ;;  %p1081_p6 = scmp.lt.s32.totalorder %s19_s18, %s19_s18 }
   0xf   :  { %p1077_p5 = scmp.ne.s32.totalorder %s19_s18, %s1076_s22  ;;  %p1082_p7 = scmp.lt.s32.totalorder %s1076_s22, %s1076_s22 }
  0x11   :  { %p1083_p8 = por %p1082_p7, %p1081_p6 }
  0x13   :  { %p1084_p9 = pnand %p1083_p8, %p1077_p5 }
  0x15   :  { %1087 = shalt.err (!%p1084_p9)
}
  0x16   :  { %s1158_s23 = smov 128   ;;  %s1159_s24 = smov 8  }
  0x17   :  { %24 = dma.hbm_to_vmem [thread:$0]  %s1425_s0, 2048, %s19_s18, [#allocation3], %s1158_s23, %s1158_s23, %s1159_s24  }
  0x18   :  { %s1160_s27 = smov [#allocation7]   ;;  %s1161_s29 = smov [#allocation8]  }
  0x19   :  { %s40_s28 = sshll.u32 %s1160_s27, 4  ;;  %s52_s1 = sshll.u32 %s1161_s29, 4  ;;  %s41_s28 = int_to_ptr.vmem [resolvable:$true] %s40_s28  ;;  %s53_s1 = int_to_ptr.vmem [resolvable:$true] %s52_s1 }
  0x1a   :  { %s1096_s30 = scalar_lea.vmem %s41_s28, 2048  ;;  %p1101_p11 = scmp.lt.s32.totalorder %s41_s28, %s41_s28 }
  0x1b   :  { %p1097_p10 = scmp.ne.s32.totalorder %s41_s28, %s1096_s30  ;;  %p1102_p12 = scmp.lt.s32.totalorder %s1096_s30, %s1096_s30 }
  0x1d   :  { %p1103_p13 = por %p1102_p12, %p1101_p11 }
  0x1f   :  { %p1104_p0 = pnand %p1103_p13, %p1097_p10 }
  0x21   :  { %1107 = shalt.err (!%p1104_p0)
}
  0x22   :  { %46 = dma.hbm_to_vmem [thread:$0]  %s1427_s2, 2048, %s41_s28, [#allocation6], %s1158_s23, %s1158_s23, %s1159_s24  }
  0x23   :  { %s1116_s0 = scalar_lea.vmem %s53_s1, 2048  ;;  %p1121_p2 = scmp.lt.s32.totalorder %s53_s1, %s53_s1 }
  0x24   :  { %p1117_p1 = scmp.ne.s32.totalorder %s53_s1, %s1116_s0  ;;  %p1122_p3 = scmp.lt.s32.totalorder %s1116_s0, %s1116_s0 }
  0x26   :  { %p1123_p4 = por %p1122_p3, %p1121_p2 }
  0x28   :  { %p1124_p5 = pnand %p1123_p4, %p1117_p1 }
  0x2a   :  { %1127 = shalt.err (!%p1124_p5)
}
  0x2b   :  { %s1162_s7 = smov 64   ;;  %s1163_s8 = smov 4  }
  0x2c   :  { %58 = dma.hbm_to_vmem [thread:$0]  %s1428_s3, 2048, %s53_s1, [#allocation9], %s1162_s7, %s1162_s7, %s1163_s8  }
  0x2d   :  { %1148 = dma.done.wait [#allocation3], 2048  }
  0x2e   :  { %1149 = vsyncadd [#allocation3], 4294965248 }
  0x2f   :  { %1150 = dma.done.wait [#allocation6], 2304  }
  0x30   :  { %1151 = vsyncadd [#allocation6], 4294964992 }
  0x31   :  { %1152 = dma.done.wait [#allocation9], 2048  }
  0x32   :  { %1153 = vsyncadd [#allocation9], 4294965248  ;;  %v72_v0 = vld [vmem:[#allocation2] sm:$0xff]  ;;  %v74_v1 = vld [vmem:[#allocation2 + $0x10] sm:$0xff]  ;;  %s1165_s2 = smov [#allocation10]  }
  0x33   :  { %88 = vadd.xlane.f32.xlu0 %v72_v0  ;;  %92 = vadd.xlane.f32.xlu1 %v74_v1  ;;  %v73_v2 = vld [vmem:[#allocation2 + $0x8] sm:$0xff]  ;;  %v75_v3 = vld [vmem:[#allocation2 + $0x18] sm:$0xff]  ;;  %v76_v4 = vld [vmem:[#allocation2 + $0x20] sm:$0xff]  ;;  %s840_s3 = sshll.u32 %s1165_s2, 4  ;;  %s841_s3 = int_to_ptr.vmem [resolvable:$true] %s840_s3 }
  0x34   :  { %v77_v5 = vld [vmem:[#allocation2 + $0x28] sm:$0xff]  ;;  %v78_v6 = vld [vmem:[#allocation2 + $0x30] sm:$0xff]  ;;  %v79_v7 = vld [vmem:[#allocation2 + $0x38] sm:$0xff]  ;;  %s1128_s11 = scalar_lea.vmem %s841_s3, 2048  ;;  %p1133_p7 = scmp.lt.s32.totalorder %s841_s3, %s841_s3 }
  0x35   :  { %v1209_v8 = vld [vmem:[#allocation2 + $0x40] sm:$0xff]  ;;  %v1211_v9 = vld [vmem:[#allocation2 + $0x48] sm:$0xff]  ;;  %v1213_v10 = vld [vmem:[#allocation2 + $0x50] sm:$0xff]  ;;  %p1129_p6 = scmp.ne.s32.totalorder %s841_s3, %s1128_s11  ;;  %p1134_p8 = scmp.lt.s32.totalorder %s1128_s11, %s1128_s11 }
  0x36   :  { %v1215_v11 = vld [vmem:[#allocation2 + $0x58] sm:$0xff]  ;;  %v1221_v12 = vld [vmem:[#allocation2 + $0x60] sm:$0xff]  ;;  %v1223_v13 = vld [vmem:[#allocation2 + $0x68] sm:$0xff] }
  0x37   :  { %90 = vadd.xlane.f32.xlu0 %v73_v2  ;;  %94 = vadd.xlane.f32.xlu1 %v75_v3  ;;  %v1227_v14 = vld [vmem:[#allocation2 + $0x70] sm:$0xff]  ;;  %v1229_v15 = vld [vmem:[#allocation2 + $0x78] sm:$0xff]  ;;  %v960_v16 = vld [vmem:[#allocation7 + $0x74] ss:$8 sps:$4 sm:$0xff]   ;;  %p1135_p9 = por %p1134_p8, %p1133_p7 }
  0x38   :  { %v962_v17 = vld [vmem:[#allocation7 + $0x70] ss:$8 sps:$4 sm:$0xff]   ;;  %417 = vmatprep.subr.bf16.mxu0 %v960_v16  ;;  %v963_v53 = vld [vmem:[#allocation7 + $0x64] ss:$8 sps:$4 sm:$0xff]   ;;  %v965_v54 = vld [vmem:[#allocation7 + $0x60] ss:$8 sps:$4 sm:$0xff]  }
  0x39   :  { %418 = vmatpush1.bf16.msra.mxu0 %v962_v17  ;;  %v966_v63 = vld [vmem:[#allocation7 + $0x54] ss:$8 sps:$4 sm:$0xff]   ;;  %v971_v17 = vld [vmem:[#allocation7 + $0x40] ss:$8 sps:$4 sm:$0xff]   ;;  %p1136_p10 = pnand %p1135_p9, %p1129_p6 }
  0x3a   :  { %419 = vmatprep.subr.bf16.mxu0 %v963_v53 }
  0x3b   :  { %96 = vadd.xlane.f32.xlu0 %v76_v4  ;;  %98 = vadd.xlane.f32.xlu1 %v77_v5 }
  0x3d   :  { %420 = vmatpush1.bf16.msra.mxu0 %v965_v54 }
  0x3e   :  { %421 = vmatprep.subr.bf16.mxu0 %v966_v63 }
  0x3f   :  { %100 = vadd.xlane.f32.xlu0 %v78_v6  ;;  %102 = vadd.xlane.f32.xlu1 %v79_v7 }
  0x43   :  { %104 = vadd.xlane.f32.xlu0 %v1209_v8  ;;  %106 = vadd.xlane.f32.xlu1 %v1211_v9 }
  0x47   :  { %108 = vadd.xlane.f32.xlu0 %v1213_v10  ;;  %110 = vadd.xlane.f32.xlu1 %v1215_v11 }
  0x4b   :  { %112 = vadd.xlane.f32.xlu0 %v1221_v12  ;;  %114 = vadd.xlane.f32.xlu1 %v1223_v13 }
  0x4f   :  { %116 = vadd.xlane.f32.xlu0 %v1227_v14  ;;  %118 = vadd.xlane.f32.xlu1 %v1229_v15 }
  0xbc   :  { %v89_v18 = vpop.xlane.xlu0 %88  ;;  %v93_v19 = vpop.xlane.xlu1 %92 }
  0xbd   :  { %v121_v20 = vmul.f32 0.0078125, %v89_v18  ;;  %v123_v21 = vmul.f32 0.0078125, %v93_v19 }
  0xbf   :  { %v1233_v22 = vsub.f32 %v72_v0, %v121_v20  ;;  %v1235_v23 = vsub.f32 %v74_v1, %v123_v21 }
  0xc0   :  { %v91_v24 = vpop.xlane.xlu0 %90  ;;  %v95_v25 = vpop.xlane.xlu1 %94 }
  0xc1   :  { %v122_v26 = vmul.f32 0.0078125, %v91_v24  ;;  %v153_v27 = vmul.f32 %v1233_v22, %v1233_v22  ;;  %v124_v28 = vmul.f32 0.0078125, %v95_v25  ;;  %v155_v31 = vmul.f32 %v1235_v23, %v1235_v23 }
  0xc3   :  { %v1239_v29 = vsub.f32 %v73_v2, %v122_v26  ;;  %169 = vadd.xlane.f32.xlu0 %v153_v27  ;;  %v1241_v30 = vsub.f32 %v75_v3, %v124_v28  ;;  %v968_v3 = vld [vmem:[#allocation7 + $0x50] ss:$8 sps:$4 sm:$0xff]  }
  0xc4   :  { %v97_v32 = vpop.xlane.xlu0 %96  ;;  %v99_v33 = vpop.xlane.xlu1 %98  ;;  %422 = vmatpush1.bf16.msra.mxu0 %v968_v3  ;;  %v974_v27 = vld [vmem:[#allocation7 + $0x30] ss:$8 sps:$4 sm:$0xff]  }
  0xc5   :  { %v125_v34 = vmul.f32 0.0078125, %v97_v32  ;;  %v154_v35 = vmul.f32 %v1239_v29, %v1239_v29  ;;  %v126_v36 = vmul.f32 0.0078125, %v99_v33  ;;  %v156_v39 = vmul.f32 %v1241_v30, %v1241_v30  ;;  %v977_v32 = vld [vmem:[#allocation7 + $0x20] ss:$8 sps:$4 sm:$0xff]   ;;  %v980_v33 = vld [vmem:[#allocation7 + $0x10] ss:$8 sps:$4 sm:$0xff]  }
  0xc7   :  { %v1247_v37 = vsub.f32 %v76_v4, %v125_v34  ;;  %173 = vadd.xlane.f32.xlu0 %v155_v31  ;;  %171 = vadd.xlane.f32.xlu1 %v154_v35  ;;  %v1249_v38 = vsub.f32 %v77_v5, %v126_v36  ;;  %v975_v31 = vld [vmem:[#allocation7 + $0x24] ss:$8 sps:$4 sm:$0xff]   ;;  %v983_v35 = vld [vmem:[#allocation7] ss:$8 sps:$4 sm:$0xff]   ;;  %v1164_v36 = vmov 0  }
  0xc8   :  { %v101_v40 = vpop.xlane.xlu0 %100  ;;  %v103_v41 = vpop.xlane.xlu1 %102  ;;  %v981_v34 = vld [vmem:[#allocation7 + $0x4] ss:$8 sps:$4 sm:$0xff]   ;;  %449 = vmatprep.mubr.bf16.mxu0 %v1164_v36 }
  0xc9   :  { %v127_v42 = vmul.f32 0.0078125, %v101_v40  ;;  %v157_v43 = vmul.f32 %v1247_v37, %v1247_v37  ;;  %v128_v44 = vmul.f32 0.0078125, %v103_v41  ;;  %v158_v47 = vmul.f32 %v1249_v38, %v1249_v38  ;;  %v985_v40 = vld [vmem:[#allocation8 + $0x38] sm:$0xff]   ;;  %v986_v41 = vld [vmem:[#allocation8 + $0x70] sm:$0xff]  }
  0xcb   :  { %v1255_v45 = vsub.f32 %v78_v6, %v127_v42  ;;  %175 = vadd.xlane.f32.xlu1 %v156_v39  ;;  %177 = vadd.xlane.f32.xlu0 %v157_v43  ;;  %v1257_v46 = vsub.f32 %v79_v7, %v128_v44  ;;  %v984_v39 = vld [vmem:[#allocation8 + $0x78] sm:$0xff]   ;;  %v987_v42 = vld [vmem:[#allocation8 + $0x30] sm:$0xff]   ;;  %v988_v43 = vld [vmem:[#allocation8 + $0x68] sm:$0xff]  }
  0xcc   :  { %v105_v48 = vpop.xlane.xlu0 %104  ;;  %v107_v49 = vpop.xlane.xlu1 %106  ;;  %886 = vmatprep.subr.bf16.mxu1 %v984_v39  ;;  %v989_v44 = vld [vmem:[#allocation8 + $0x28] sm:$0xff]  }
  0xcd   :  { %v129_v50 = vmul.f32 0.0078125, %v105_v48  ;;  %v159_v51 = vmul.f32 %v1255_v45, %v1255_v45  ;;  %v130_v52 = vmul.f32 0.0078125, %v107_v49  ;;  %v160_v57 = vmul.f32 %v1257_v46, %v1257_v46  ;;  %887 = vmatpush3.bf16.msra.mxu1 %v985_v40  ;;  %v991_v48 = vld [vmem:[#allocation8 + $0x20] sm:$0xff]   ;;  %v992_v49 = vld [vmem:[#allocation8 + $0x58] sm:$0xff]  }
  0xce   :  { %888 = vmatprep.subr.bf16.mxu1 %v986_v41 }
  0xcf   :  { %v1264_v55 = vsub.f32 %v1209_v8, %v129_v50  ;;  %179 = vadd.xlane.f32.xlu1 %v158_v47  ;;  %181 = vadd.xlane.f32.xlu0 %v159_v51  ;;  %v1267_v56 = vsub.f32 %v1211_v9, %v130_v52  ;;  %v969_v9 = vld [vmem:[#allocation7 + $0x44] ss:$8 sps:$4 sm:$0xff]   ;;  %v993_v50 = vld [vmem:[#allocation8 + $0x18] sm:$0xff]  }
  0xd0   :  { %v109_v58 = vpop.xlane.xlu0 %108  ;;  %v111_v59 = vpop.xlane.xlu1 %110  ;;  %423 = vmatprep.subr.bf16.mxu0 %v969_v9  ;;  %v990_v47 = vld [vmem:[#allocation8 + $0x60] sm:$0xff]  }
  0xd1   :  { %v131_v60 = vmul.f32 0.0078125, %v109_v58  ;;  %v161_v61 = vmul.f32 %v1264_v55, %v1264_v55  ;;  %v132_v62 = vmul.f32 0.0078125, %v111_v59  ;;  %v162_v2 = vmul.f32 %v1267_v56, %v1267_v56  ;;  %424 = vmatpush1.bf16.msra.mxu0 %v971_v17  ;;  %889 = vmatpush3.bf16.msra.mxu1 %v987_v42 }
  0xd2   :  { %890 = vmatprep.subr.bf16.mxu1 %v988_v43 }
  0xd3   :  { %v1274_v0 = vsub.f32 %v1213_v10, %v131_v60  ;;  %183 = vadd.xlane.f32.xlu1 %v160_v57  ;;  %185 = vadd.xlane.f32.xlu0 %v161_v61  ;;  %v1277_v1 = vsub.f32 %v1215_v11, %v132_v62 }
  0xd4   :  { %v113_v4 = vpop.xlane.xlu0 %112  ;;  %v115_v5 = vpop.xlane.xlu1 %114 }
  0xd5   :  { %v133_v6 = vmul.f32 0.0078125, %v113_v4  ;;  %v163_v7 = vmul.f32 %v1274_v0, %v1274_v0  ;;  %v134_v8 = vmul.f32 0.0078125, %v115_v5  ;;  %v164_v16 = vmul.f32 %v1277_v1, %v1277_v1  ;;  %891 = vmatpush3.bf16.msra.mxu1 %v989_v44 }
  0xd6   :  { %892 = vmatprep.subr.bf16.mxu1 %v990_v47 }
  0xd7   :  { %v1284_v10 = vsub.f32 %v1221_v12, %v133_v6  ;;  %187 = vadd.xlane.f32.xlu1 %v162_v2  ;;  %189 = vadd.xlane.f32.xlu0 %v163_v7  ;;  %v1287_v11 = vsub.f32 %v1223_v13, %v134_v8  ;;  %v972_v12 = vld [vmem:[#allocation7 + $0x34] ss:$8 sps:$4 sm:$0xff]  }
  0xd8   :  { %v117_v18 = vpop.xlane.xlu0 %116  ;;  %v119_v19 = vpop.xlane.xlu1 %118  ;;  %425 = vmatprep.subr.bf16.mxu0 %v972_v12 }
  0xd9   :  { %v135_v20 = vmul.f32 0.0078125, %v117_v18  ;;  %v165_v21 = vmul.f32 %v1284_v10, %v1284_v10  ;;  %v136_v24 = vmul.f32 0.0078125, %v119_v19  ;;  %v166_v26 = vmul.f32 %v1287_v11, %v1287_v11  ;;  %426 = vmatpush1.bf16.msra.mxu0 %v974_v27  ;;  %893 = vmatpush3.bf16.msra.mxu1 %v991_v48 }
  0xda   :  { %427 = vmatprep.subr.bf16.mxu0 %v975_v31  ;;  %894 = vmatprep.subr.bf16.mxu1 %v992_v49 }
  0xdb   :  { %v1294_v25 = vsub.f32 %v1227_v14, %v135_v20  ;;  %191 = vadd.xlane.f32.xlu1 %v164_v16  ;;  %193 = vadd.xlane.f32.xlu0 %v165_v21  ;;  %v1297_v13 = vsub.f32 %v1229_v15, %v136_v24  ;;  %v978_v15 = vld [vmem:[#allocation7 + $0x14] ss:$8 sps:$4 sm:$0xff]   ;;  %v1307_v21 = vld [vmem:[#allocation5] ss:$0 sm:$0xff] }
  0xdd   :  { %v167_v28 = vmul.f32 %v1294_v25, %v1294_v25  ;;  %v168_v14 = vmul.f32 %v1297_v13, %v1297_v13  ;;  %428 = vmatpush1.bf16.msra.mxu0 %v977_v32  ;;  %895 = vmatpush3.bf16.msra.mxu1 %v993_v50 }
  0xde   :  { %429 = vmatprep.subr.bf16.mxu0 %v978_v15  ;;  %v1311_v15 = vld [vmem:[#allocation5 + $0x1] ss:$0 sm:$0xff] }
  0xdf   :  { %195 = vadd.xlane.f32.xlu1 %v166_v26  ;;  %197 = vadd.xlane.f32.xlu0 %v167_v28 }
  0xe1   :  { %430 = vmatpush1.bf16.msra.mxu0 %v980_v33 }
  0xe2   :  { %431 = vmatprep.subr.bf16.mxu0 %v981_v34 }
  0xe3   :  { %199 = vadd.xlane.f32.xlu1 %v168_v14 }
  0xe5   :  { %432 = vmatpush1.bf16.msra.mxu0 %v983_v35 }
 0x14c   :  { %v170_v51 = vpop.xlane.xlu0 %169 }
 0x14d   :  { %v201_v52 = vmul.f32 0.0078125, %v170_v51 }
 0x14f   :  { %v219_v53 = vadd.f32 1e-05, %v201_v52 }
 0x150   :  { %v172_v54 = vpop.xlane.xlu1 %171  ;;  %v174_v57 = vpop.xlane.xlu0 %173 }
 0x151   :  { %1000 = vrsqrt.f32 %v219_v53  ;;  %v202_v58 = vmul.f32 0.0078125, %v172_v54  ;;  %v203_v59 = vmul.f32 0.0078125, %v174_v57 }
 0x153   :  { %v220_v60 = vadd.f32 1e-05, %v202_v58  ;;  %v221_v61 = vadd.f32 1e-05, %v203_v59 }
 0x154   :  { %v176_v62 = vpop.xlane.xlu1 %175  ;;  %v178_v63 = vpop.xlane.xlu0 %177 }
 0x155   :  { %1002 = vrsqrt.f32 %v220_v60  ;;  %v204_v2 = vmul.f32 0.0078125, %v176_v62  ;;  %v205_v4 = vmul.f32 0.0078125, %v178_v63 }
 0x156   :  { %1004 = vrsqrt.f32 %v221_v61 }
 0x157   :  { %v222_v3 = vadd.f32 1e-05, %v204_v2  ;;  %v223_v7 = vadd.f32 1e-05, %v205_v4 }
 0x158   :  { %v180_v5 = vpop.xlane.xlu1 %179  ;;  %v182_v9 = vpop.xlane.xlu0 %181 }
 0x159   :  { %1006 = vrsqrt.f32 %v222_v3  ;;  %v206_v6 = vmul.f32 0.0078125, %v180_v5  ;;  %v207_v19 = vmul.f32 0.0078125, %v182_v9 }
 0x15b   :  { %v224_v8 = vadd.f32 1e-05, %v206_v6  ;;  %v225_v26 = vadd.f32 1e-05, %v207_v19 }
 0x15c   :  { %v184_v16 = vpop.xlane.xlu1 %183  ;;  %v186_v28 = vpop.xlane.xlu0 %185 }
 0x15d   :  { %1008 = vrsqrt.f32 %v224_v8  ;;  %v208_v17 = vmul.f32 0.0078125, %v184_v16 }
 0x15e   :  { %v1001_v18 = vpop.eup %1000  ;;  %1010 = vrsqrt.f32 %v223_v7 }
 0x15f   :  { %v251_v20 = vmul.f32 %v1001_v18, %v1233_v22  ;;  %v226_v24 = vadd.f32 1e-05, %v208_v17  ;;  %v209_v22 = vmul.f32 0.0078125, %v186_v28 }
 0x160   :  { %v188_v27 = vpop.xlane.xlu1 %187  ;;  %v190_v52 = vpop.xlane.xlu0 %189 }
 0x161   :  { %v267_v14 = vmul.f32 %v251_v20, %v1307_v21  ;;  %1012 = vrsqrt.f32 %v226_v24  ;;  %v210_v33 = vmul.f32 0.0078125, %v188_v27  ;;  %v227_v49 = vadd.f32 1e-05, %v209_v22 }
 0x162   :  { %v1003_v12 = vpop.eup %1002  ;;  %1014 = vrsqrt.f32 %v225_v26  ;;  %v211_v54 = vmul.f32 0.0078125, %v190_v52 }
 0x163   :  { %v252_v31 = vmul.f32 %v1003_v12, %v1239_v29  ;;  %v1005_v32 = vpop.eup %1004  ;;  %v283_v39 = vadd.f32 %v267_v14, %v1311_v15  ;;  %v228_v42 = vadd.f32 1e-05, %v210_v33 }
 0x164   :  { %v253_v41 = vmul.f32 %v1005_v32, %v1235_v23  ;;  %v192_v47 = vpop.xlane.xlu1 %191  ;;  %v229_v3 = vadd.f32 1e-05, %v211_v54  ;;  %v194_v5 = vpop.xlane.xlu0 %193 }
 0x165   :  { %v268_v34 = vmul.f32 %v252_v31, %v1307_v21  ;;  %1016 = vrsqrt.f32 %v228_v42  ;;  %v212_v53 = vmul.f32 0.0078125, %v192_v47  ;;  %v213_v7 = vmul.f32 0.0078125, %v194_v5  ;;  %v998_v5 = vld [vmem:[#allocation8 + $0x40] sm:$0xff]  }
 0x166   :  { %v1007_v35 = vpop.eup %1006  ;;  %v269_v50 = vmul.f32 %v253_v41, %v1307_v21  ;;  %1018 = vrsqrt.f32 %v227_v49 }
 0x167   :  { %v284_v40 = vadd.f32 %v268_v34, %v1311_v15  ;;  %v254_v29 = vmul.f32 %v1007_v35, %v1241_v30  ;;  %v230_v59 = vadd.f32 1e-05, %v212_v53  ;;  %v231_v24 = vadd.f32 1e-05, %v213_v7 }
 0x168   :  { %v285_v57 = vadd.f32 %v269_v50, %v1311_v15  ;;  %v196_v63 = vpop.xlane.xlu1 %195  ;;  %v198_v27 = vpop.xlane.xlu0 %197  ;;  %v301_v7 = vld [vmem:[#allocation5 + $0x3] ss:$8 sm:$0x3] }
 0x169   :  { %v302_v43 = vpack.c.bf16 %v284_v40, %v283_v39  ;;  %v270_v48 = vmul.f32 %v254_v29, %v1307_v21  ;;  %1020 = vrsqrt.f32 %v230_v59  ;;  %v215_v31 = vmul.f32 0.0078125, %v198_v27 }
 0x16a   :  { %v1009_v44 = vpop.eup %1008  ;;  %1022 = vrsqrt.f32 %v229_v3  ;;  %v994_v3 = vld [vmem:[#allocation8 + $0x50] sm:$0xff]  }
 0x16b   :  { %450 = vmatmul.mubr.bf16.vlgmr.msra.gmra.mxu0 %v302_v43  ;;  %v1011_v51 = vpop.eup %1010  ;;  %v286_v23 = vadd.f32 %v270_v48, %v1311_v15  ;;  %v256_v30 = vmul.f32 %v1009_v44, %v1249_v38  ;;  %v214_v38 = vmul.f32 0.0078125, %v196_v63  ;;  %v233_v39 = vadd.f32 1e-05, %v215_v31  ;;  %896 = vmatprep.subr.bf16.mxu1 %v994_v3 }
 0x16c   :  { %459 = vmatprep.mubr.bf16.mxu0 %v1164_v36  ;;  %v255_v58 = vmul.f32 %v1011_v51, %v1247_v37  ;;  %v200_v20 = vpop.xlane.xlu1 %199 }
 0x16d   :  { %v303_v60 = vpack.c.bf16 %v286_v23, %v285_v57  ;;  %v272_v61 = vmul.f32 %v256_v30, %v1307_v21  ;;  %v232_v16 = vadd.f32 1e-05, %v214_v38  ;;  %v999_v38 = vld [vmem:[#allocation8] sm:$0xff]  }
 0x16e   :  { %v1013_v62 = vpop.eup %1012  ;;  %v271_v4 = vmul.f32 %v255_v58, %v1307_v21 }
 0x16f   :  { %v1015_v2 = vpop.eup %1014  ;;  %v288_v6 = vadd.f32 %v272_v61, %v1311_v15  ;;  %v258_v37 = vmul.f32 %v1013_v62, %v1257_v46  ;;  %1024 = vrsqrt.f32 %v232_v16  ;;  %v216_v46 = vmul.f32 0.0078125, %v200_v20 }
 0x170   :  { %v287_v8 = vadd.f32 %v271_v4, %v1311_v15  ;;  %v257_v9 = vmul.f32 %v1015_v2, %v1255_v45  ;;  %1026 = vrsqrt.f32 %v231_v24  ;;  %v996_v4 = vld [vmem:[#allocation8 + $0x48] sm:$0xff]  }
 0x171   :  { %v274_v18 = vmul.f32 %v258_v37, %v1307_v21  ;;  %v234_v33 = vadd.f32 1e-05, %v216_v46 }
 0x172   :  { %v304_v17 = vpack.c.bf16 %v288_v6, %v287_v8  ;;  %v1017_v19 = vpop.eup %1016  ;;  %v273_v12 = vmul.f32 %v257_v9, %v1307_v21 }
 0x173   :  { %460 = vmatmul.mubr.bf16.gmra.mxu0 %v303_v60  ;;  %v1019_v26 = vpop.eup %1018  ;;  %v290_v28 = vadd.f32 %v274_v18, %v1311_v15  ;;  %v260_v45 = vmul.f32 %v1017_v19, %v1267_v56  ;;  %1028 = vrsqrt.f32 %v234_v33 }
 0x174   :  { %469 = vmatprep.mubr.bf16.mxu0 %v1164_v36  ;;  %v289_v14 = vadd.f32 %v273_v12, %v1311_v15  ;;  %v259_v32 = vmul.f32 %v1019_v26, %v1264_v55  ;;  %1030 = vrsqrt.f32 %v233_v39 }
 0x175   :  { %v276_v35 = vmul.f32 %v260_v45, %v1307_v21 }
 0x176   :  { %v305_v34 = vpack.c.bf16 %v290_v28, %v289_v14  ;;  %v1021_v22 = vpop.eup %1020  ;;  %v275_v40 = vmul.f32 %v259_v32, %v1307_v21 }
 0x177   :  { %v1023_v41 = vpop.eup %1022  ;;  %v292_v56 = vadd.f32 %v276_v35, %v1311_v15  ;;  %v262_v29 = vmul.f32 %v1021_v22, %v1277_v1 }
 0x178   :  { %v291_v55 = vadd.f32 %v275_v40, %v1311_v15  ;;  %v261_v42 = vmul.f32 %v1023_v41, %v1274_v0 }
 0x179   :  { %v278_v44 = vmul.f32 %v262_v29, %v1307_v21 }
 0x17a   :  { %v306_v43 = vpack.c.bf16 %v292_v56, %v291_v55  ;;  %v277_v48 = vmul.f32 %v261_v42, %v1307_v21 }
 0x17b   :  { %470 = vmatmul.mubr.bf16.gmra.mxu0 %v304_v17  ;;  %v294_v50 = vadd.f32 %v278_v44, %v1311_v15 }
 0x17c   :  { %479 = vmatprep.mubr.bf16.mxu0 %v1164_v36  ;;  %v1025_v47 = vpop.eup %1024  ;;  %v293_v1 = vadd.f32 %v277_v48, %v1311_v15 }
 0x17d   :  { %v1027_v49 = vpop.eup %1026  ;;  %v264_v51 = vmul.f32 %v1025_v47, %v1287_v11 }
 0x17e   :  { %v263_v52 = vmul.f32 %v1027_v49, %v1284_v10  ;;  %v307_v53 = vpack.c.bf16 %v294_v50, %v293_v1 }
 0x17f   :  { %v280_v0 = vmul.f32 %v264_v51, %v1307_v21 }
 0x180   :  { %v1029_v23 = vpop.eup %1028  ;;  %v279_v30 = vmul.f32 %v263_v52, %v1307_v21 }
 0x181   :  { %v1031_v54 = vpop.eup %1030  ;;  %v296_v57 = vadd.f32 %v280_v0, %v1311_v15  ;;  %v266_v58 = vmul.f32 %v1029_v23, %v1297_v13  ;;  %v995_v13 = vld [vmem:[#allocation8 + $0x10] sm:$0xff]  }
 0x182   :  { %v295_v11 = vadd.f32 %v279_v30, %v1311_v15  ;;  %v265_v59 = vmul.f32 %v1031_v54, %v1294_v25  ;;  %897 = vmatpush3.bf16.msra.mxu1 %v995_v13  ;;  %v997_v25 = vld [vmem:[#allocation8 + $0x8] sm:$0xff]  }
 0x183   :  { %480 = vmatmul.mubr.bf16.gmra.mxu0 %v305_v34  ;;  %v282_v10 = vmul.f32 %v266_v58, %v1307_v21  ;;  %898 = vmatprep.subr.bf16.mxu1 %v996_v4 }
 0x184   :  { %489 = vmatprep.mubr.bf16.mxu0 %v1164_v36  ;;  %v308_v60 = vpack.c.bf16 %v296_v57, %v295_v11  ;;  %v281_v61 = vmul.f32 %v265_v59, %v1307_v21  ;;  %v327_v21 = vlaneseq }
 0x185   :  { %v298_v62 = vadd.f32 %v282_v10, %v1311_v15 }
 0x186   :  { %v297_v63 = vadd.f32 %v281_v61, %v1311_v15  ;;  %899 = vmatpush3.bf16.msra.mxu1 %v997_v25 }
 0x187   :  { %900 = vmatprep.subr.bf16.mxu1 %v998_v5 }
 0x188   :  { %v309_v2 = vpack.c.bf16 %v298_v62, %v297_v63 }
 0x18a   :  { %901 = vmatpush3.bf16.msra.mxu1 %v999_v38 }
 0x18b   :  { %490 = vmatmul.mubr.bf16.gmra.mxu0 %v306_v43 }
 0x18c   :  { %499 = vmatprep.mubr.bf16.mxu0 %v1164_v36 }
 0x193   :  { %500 = vmatmul.mubr.bf16.gmra.mxu0 %v307_v53 }
 0x194   :  { %509 = vmatprep.mubr.bf16.mxu0 %v1164_v36 }
 0x19b   :  { %510 = vmatmul.mubr.bf16.gmra.mxu0 %v308_v60 }
 0x19c   :  { %519 = vmatprep.mubr.bf16.mxu0 %v1164_v36  ;;  %v328_v36 = vshrl.u32 %v327_v21, 7 }
 0x19e   :  { %v333_v6 = vsub.s32 1, %v328_v36  ;;  %v329_v37 = vsub.s32 0, %v328_v36 }
 0x1a0   :  { %v1365_v8 = vrot.slane %v301_v7, %v333_v6  ;;  %v1367_v9 = vrot.slane %v301_v7, %v329_v37 }
 0x1a3   :  { %520 = vmatmul.mubr.bf16.gmra.mxu0 %v309_v2 }
 0x22b   :  { %v451_v15 = vpop.f32.mrf.mxu0 }
 0x22c   :  { %v452_v20 = vadd.f32 %v451_v15, %v1367_v9 }
 0x22d   :  { %v453_v16 = vpop.f32.mrf.mxu0 }
 0x22e   :  { %v454_v18 = vadd.f32 %v453_v16, %v1365_v8  ;;  %v530_v45 = vmax.f32 %v452_v20, 0.0 }
 0x22f   :  { %v455_v17 = vpop.f32.mrf.mxu0 }
 0x230   :  { %v456_v19 = vadd.f32 %v455_v17, %v1367_v9  ;;  %v531_v46 = vmax.f32 %v454_v18, 0.0 }
 0x231   :  { %v457_v24 = vpop.f32.mrf.mxu0 }
 0x232   :  { %v458_v12 = vadd.f32 %v457_v24, %v1365_v8  ;;  %v532_v26 = vmax.f32 %v456_v19, 0.0 }
 0x233   :  { %v461_v27 = vpop.f32.mrf.mxu0 }
 0x234   :  { %v533_v28 = vmax.f32 %v458_v12, 0.0  ;;  %v562_v32 = vpack.c.bf16 %v532_v26, %v530_v45  ;;  %v462_v22 = vadd.f32 %v461_v27, %v1367_v9 }
 0x235   :  { %v463_v31 = vpop.f32.mrf.mxu0 }
 0x236   :  { %v563_v14 = vpack.c.bf16 %v533_v28, %v531_v46  ;;  %v464_v34 = vadd.f32 %v463_v31, %v1365_v8  ;;  %v534_v42 = vmax.f32 %v462_v22, 0.0 }
 0x237   :  { %v465_v33 = vpop.f32.mrf.mxu0 }
 0x238   :  { %v466_v35 = vadd.f32 %v465_v33, %v1367_v9  ;;  %738 = vmatprep.mubr.bf16.mxu1 %v563_v14  ;;  %v535_v29 = vmax.f32 %v464_v34, 0.0 }
 0x239   :  { %v467_v39 = vpop.f32.mrf.mxu0  ;;  %739 = vmatmul.mubr.bf16.vlgmr.msra.gmra.mxu1 %v562_v32 }
 0x23a   :  { %v468_v40 = vadd.f32 %v467_v39, %v1365_v8  ;;  %v536_v41 = vmax.f32 %v466_v35, 0.0 }
 0x23b   :  { %v471_v56 = vpop.f32.mrf.mxu0 }
 0x23c   :  { %v537_v55 = vmax.f32 %v468_v40, 0.0  ;;  %v564_v47 = vpack.c.bf16 %v536_v41, %v534_v42  ;;  %v472_v51 = vadd.f32 %v471_v56, %v1367_v9 }
 0x23d   :  { %v473_v43 = vpop.f32.mrf.mxu0 }
 0x23e   :  { %v565_v44 = vpack.c.bf16 %v537_v55, %v535_v29  ;;  %v474_v49 = vadd.f32 %v473_v43, %v1365_v8  ;;  %v538_v54 = vmax.f32 %v472_v51, 0.0 }
 0x23f   :  { %v475_v48 = vpop.f32.mrf.mxu0 }
 0x240   :  { %v476_v50 = vadd.f32 %v475_v48, %v1367_v9  ;;  %746 = vmatprep.mubr.bf16.mxu1 %v565_v44  ;;  %v539_v23 = vmax.f32 %v474_v49, 0.0 }
 0x241   :  { %v477_v1 = vpop.f32.mrf.mxu0  ;;  %747 = vmatmul.mubr.bf16.gmra.mxu1 %v564_v47 }
 0x242   :  { %v478_v52 = vadd.f32 %v477_v1, %v1365_v8  ;;  %v540_v53 = vmax.f32 %v476_v50, 0.0 }
 0x243   :  { %v481_v0 = vpop.f32.mrf.mxu0 }
 0x244   :  { %v541_v30 = vmax.f32 %v478_v52, 0.0  ;;  %v566_v11 = vpack.c.bf16 %v540_v53, %v538_v54  ;;  %v482_v61 = vadd.f32 %v481_v0, %v1367_v9 }
 0x245   :  { %v483_v57 = vpop.f32.mrf.mxu0 }
 0x246   :  { %v567_v58 = vpack.c.bf16 %v541_v30, %v539_v23  ;;  %v484_v60 = vadd.f32 %v483_v57, %v1365_v8  ;;  %v542_v25 = vmax.f32 %v482_v61, 0.0 }
 0x247   :  { %v485_v59 = vpop.f32.mrf.mxu0 }
 0x248   :  { %v486_v10 = vadd.f32 %v485_v59, %v1367_v9  ;;  %754 = vmatprep.mubr.bf16.mxu1 %v567_v58  ;;  %v543_v13 = vmax.f32 %v484_v60, 0.0 }
 0x249   :  { %v487_v62 = vpop.f32.mrf.mxu0  ;;  %755 = vmatmul.mubr.bf16.gmra.mxu1 %v566_v11 }
 0x24a   :  { %v488_v63 = vadd.f32 %v487_v62, %v1365_v8  ;;  %v544_v2 = vmax.f32 %v486_v10, 0.0 }
 0x24b   :  { %v491_v3 = vpop.f32.mrf.mxu0 }
 0x24c   :  { %v545_v4 = vmax.f32 %v488_v63, 0.0  ;;  %v568_v21 = vpack.c.bf16 %v544_v2, %v542_v25  ;;  %v492_v7 = vadd.f32 %v491_v3, %v1367_v9  ;;  %v1401_v3 = vld [vmem:[#allocation5 + $0x2] ss:$0 sm:$0xff] }
 0x24d   :  { %v493_v5 = vpop.f32.mrf.mxu0 }
 0x24e   :  { %v569_v38 = vpack.c.bf16 %v545_v4, %v543_v13  ;;  %v494_v6 = vadd.f32 %v493_v5, %v1365_v8  ;;  %v546_v24 = vmax.f32 %v492_v7, 0.0  ;;  %v1033_v7 = vld [vmem:[#allocation2 + $0x8] sm:$0xff] }
 0x24f   :  { %v495_v36 = vpop.f32.mrf.mxu0 }
 0x250   :  { %v496_v37 = vadd.f32 %v495_v36, %v1367_v9  ;;  %762 = vmatprep.mubr.bf16.mxu1 %v569_v38  ;;  %v547_v19 = vmax.f32 %v494_v6, 0.0  ;;  %v1032_v38 = vld [vmem:[#allocation2] sm:$0xff] }
 0x251   :  { %v497_v15 = vpop.f32.mrf.mxu0  ;;  %763 = vmatmul.mubr.bf16.gmra.mxu1 %v568_v21 }
 0x252   :  { %v498_v16 = vadd.f32 %v497_v15, %v1365_v8  ;;  %v548_v17 = vmax.f32 %v496_v37, 0.0 }
 0x253   :  { %v501_v18 = vpop.f32.mrf.mxu0 }
 0x254   :  { %v549_v20 = vmax.f32 %v498_v16, 0.0  ;;  %v570_v27 = vpack.c.bf16 %v548_v17, %v546_v24  ;;  %v502_v31 = vadd.f32 %v501_v18, %v1367_v9 }
 0x255   :  { %v503_v12 = vpop.f32.mrf.mxu0 }
 0x256   :  { %v571_v26 = vpack.c.bf16 %v549_v20, %v547_v19  ;;  %v504_v28 = vadd.f32 %v503_v12, %v1365_v8  ;;  %v550_v39 = vmax.f32 %v502_v31, 0.0  ;;  %v1034_v20 = vld [vmem:[#allocation2 + $0x10] sm:$0xff] }
 0x257   :  { %v505_v46 = vpop.f32.mrf.mxu0 }
 0x258   :  { %v506_v45 = vadd.f32 %v505_v46, %v1367_v9  ;;  %770 = vmatprep.mubr.bf16.mxu1 %v571_v26  ;;  %v551_v35 = vmax.f32 %v504_v28, 0.0  ;;  %v1035_v28 = vld [vmem:[#allocation2 + $0x18] sm:$0xff] }
 0x259   :  { %v507_v14 = vpop.f32.mrf.mxu0  ;;  %771 = vmatmul.mubr.bf16.gmra.mxu1 %v570_v27 }
 0x25a   :  { %v508_v32 = vadd.f32 %v507_v14, %v1365_v8  ;;  %v552_v33 = vmax.f32 %v506_v45, 0.0 }
 0x25b   :  { %v511_v34 = vpop.f32.mrf.mxu0 }
 0x25c   :  { %v553_v22 = vmax.f32 %v508_v32, 0.0  ;;  %v572_v56 = vpack.c.bf16 %v552_v33, %v550_v39  ;;  %v512_v43 = vadd.f32 %v511_v34, %v1367_v9  ;;  %v1036_v34 = vld [vmem:[#allocation2 + $0x20] sm:$0xff] }
 0x25d   :  { %v513_v40 = vpop.f32.mrf.mxu0 }
 0x25e   :  { %v573_v41 = vpack.c.bf16 %v553_v22, %v551_v35  ;;  %v514_v55 = vadd.f32 %v513_v40, %v1365_v8  ;;  %v554_v1 = vmax.f32 %v512_v43, 0.0 }
 0x25f   :  { %v515_v29 = vpop.f32.mrf.mxu0 }
 0x260   :  { %v516_v42 = vadd.f32 %v515_v29, %v1367_v9  ;;  %778 = vmatprep.mubr.bf16.mxu1 %v573_v41  ;;  %v555_v50 = vmax.f32 %v514_v55, 0.0 }
 0x261   :  { %v517_v44 = vpop.f32.mrf.mxu0  ;;  %779 = vmatmul.mubr.bf16.gmra.mxu1 %v572_v56  ;;  %v1037_v56 = vld [vmem:[#allocation2 + $0x28] sm:$0xff] }
 0x262   :  { %v518_v47 = vadd.f32 %v517_v44, %v1365_v8  ;;  %v556_v48 = vmax.f32 %v516_v42, 0.0 }
 0x263   :  { %v521_v49 = vpop.f32.mrf.mxu0 }
 0x264   :  { %v557_v51 = vmax.f32 %v518_v47, 0.0  ;;  %v574_v0 = vpack.c.bf16 %v556_v48, %v554_v1  ;;  %v522_v57 = vadd.f32 %v521_v49, %v1367_v9  ;;  %v1038_v47 = vld [vmem:[#allocation2 + $0x30] sm:$0xff] }
 0x265   :  { %v523_v52 = vpop.f32.mrf.mxu0 }
 0x266   :  { %v575_v53 = vpack.c.bf16 %v557_v51, %v555_v50  ;;  %v524_v30 = vadd.f32 %v523_v52, %v1365_v8  ;;  %v558_v61 = vmax.f32 %v522_v57, 0.0  ;;  %v1039_v52 = vld [vmem:[#allocation2 + $0x38] sm:$0xff]  ;;  %v1040_v57 = vld [vmem:[#allocation2 + $0x40] sm:$0xff] }
 0x267   :  { %v525_v23 = vpop.f32.mrf.mxu0 }
 0x268   :  { %v526_v54 = vadd.f32 %v525_v23, %v1367_v9  ;;  %786 = vmatprep.mubr.bf16.mxu1 %v575_v53  ;;  %v559_v60 = vmax.f32 %v524_v30, 0.0 }
 0x269   :  { %v527_v58 = vpop.f32.mrf.mxu0  ;;  %787 = vmatmul.mubr.bf16.gmra.mxu1 %v574_v0 }
 0x26a   :  { %v528_v11 = vadd.f32 %v527_v58, %v1365_v8  ;;  %v560_v59 = vmax.f32 %v526_v54, 0.0 }
 0x26c   :  { %v561_v10 = vmax.f32 %v528_v11, 0.0  ;;  %v576_v63 = vpack.c.bf16 %v560_v59, %v558_v61  ;;  %v1041_v61 = vld [vmem:[#allocation2 + $0x48] sm:$0xff] }
 0x26e   :  { %v577_v62 = vpack.c.bf16 %v561_v10, %v559_v60 }
 0x270   :  { %794 = vmatprep.mubr.bf16.mxu1 %v577_v62 }
 0x271   :  { %795 = vmatmul.mubr.bf16.gmra.mxu1 %v576_v63 }
 0x2f9   :  { %v902_v2 = vpop.f32.mrf.mxu1 }
 0x2fb   :  { %v903_v13 = vpop.f32.mrf.mxu1 }
 0x2fc   :  { %v904_v4 = vadd.f32 %v903_v13, %v902_v2 }
 0x2fd   :  { %v905_v25 = vpop.f32.mrf.mxu1 }
 0x2fe   :  { %v741_v9 = vadd.f32 %v904_v4, %v1401_v3 }
 0x2ff   :  { %v906_v5 = vpop.f32.mrf.mxu1 }
 0x300   :  { %v803_v21 = vadd.f32 %v1032_v38, %v741_v9  ;;  %v907_v8 = vadd.f32 %v906_v5, %v905_v25  ;;  %v1042_v25 = vld [vmem:[#allocation2 + $0x50] sm:$0xff] }
 0x301   :  { %v908_v36 = vpop.f32.mrf.mxu1 }
 0x302   :  { %819 = vst [vmem:[#allocation10] sm:$0xff] %v803_v21  ;;  %v744_v6 = vadd.f32 %v907_v8, %v1401_v3 }
 0x303   :  { %v909_v37 = vpop.f32.mrf.mxu1 }
 0x304   :  { %v804_v15 = vadd.f32 %v1033_v7, %v744_v6  ;;  %v910_v16 = vadd.f32 %v909_v37, %v908_v36  ;;  %v1043_v36 = vld [vmem:[#allocation2 + $0x58] sm:$0xff] }
 0x305   :  { %v911_v17 = vpop.f32.mrf.mxu1 }
 0x306   :  { %820 = vst [vmem:[#allocation10 + $0x8] sm:$0xff] %v804_v15  ;;  %v749_v18 = vadd.f32 %v910_v16, %v1401_v3 }
 0x307   :  { %v912_v19 = vpop.f32.mrf.mxu1 }
 0x308   :  { %v805_v24 = vadd.f32 %v1034_v20, %v749_v18  ;;  %v913_v12 = vadd.f32 %v912_v19, %v911_v17  ;;  %v1044_v17 = vld [vmem:[#allocation2 + $0x60] sm:$0xff] }
 0x309   :  { %v914_v26 = vpop.f32.mrf.mxu1 }
 0x30a   :  { %821 = vst [vmem:[#allocation10 + $0x10] sm:$0xff] %v805_v24  ;;  %v752_v27 = vadd.f32 %v913_v12, %v1401_v3 }
 0x30b   :  { %v915_v46 = vpop.f32.mrf.mxu1 }
 0x30c   :  { %v806_v45 = vadd.f32 %v1035_v28, %v752_v27  ;;  %v916_v31 = vadd.f32 %v915_v46, %v914_v26  ;;  %v1045_v26 = vld [vmem:[#allocation2 + $0x68] sm:$0xff] }
 0x30d   :  { %v917_v14 = vpop.f32.mrf.mxu1 }
 0x30e   :  { %822 = vst [vmem:[#allocation10 + $0x18] sm:$0xff] %v806_v45  ;;  %v757_v32 = vadd.f32 %v916_v31, %v1401_v3 }
 0x30f   :  { %v918_v33 = vpop.f32.mrf.mxu1 }
 0x310   :  { %v807_v35 = vadd.f32 %v1036_v34, %v757_v32  ;;  %v919_v22 = vadd.f32 %v918_v33, %v917_v14  ;;  %v1046_v14 = vld [vmem:[#allocation2 + $0x70] sm:$0xff] }
 0x311   :  { %v920_v39 = vpop.f32.mrf.mxu1 }
 0x312   :  { %823 = vst [vmem:[#allocation10 + $0x20] sm:$0xff] %v807_v35  ;;  %v760_v40 = vadd.f32 %v919_v22, %v1401_v3  ;;  %v1047_v35 = vld [vmem:[#allocation2 + $0x78] sm:$0xff] }
 0x313   :  { %v921_v41 = vpop.f32.mrf.mxu1 }
 0x314   :  { %v808_v29 = vadd.f32 %v1037_v56, %v760_v40  ;;  %v922_v55 = vadd.f32 %v921_v41, %v920_v39 }
 0x315   :  { %v923_v42 = vpop.f32.mrf.mxu1 }
 0x316   :  { %824 = vst [vmem:[#allocation10 + $0x28] sm:$0xff] %v808_v29  ;;  %v765_v43 = vadd.f32 %v922_v55, %v1401_v3 }
 0x317   :  { %v924_v44 = vpop.f32.mrf.mxu1 }
 0x318   :  { %v809_v48 = vadd.f32 %v1038_v47, %v765_v43  ;;  %v925_v49 = vadd.f32 %v924_v44, %v923_v42 }
 0x319   :  { %v926_v50 = vpop.f32.mrf.mxu1 }
 0x31a   :  { %825 = vst [vmem:[#allocation10 + $0x30] sm:$0xff] %v809_v48  ;;  %v768_v51 = vadd.f32 %v925_v49, %v1401_v3 }
 0x31b   :  { %v927_v1 = vpop.f32.mrf.mxu1 }
 0x31c   :  { %v810_v53 = vadd.f32 %v1039_v52, %v768_v51  ;;  %v928_v0 = vadd.f32 %v927_v1, %v926_v50 }
 0x31d   :  { %v929_v23 = vpop.f32.mrf.mxu1 }
 0x31e   :  { %826 = vst [vmem:[#allocation10 + $0x38] sm:$0xff] %v810_v53  ;;  %v773_v30 = vadd.f32 %v928_v0, %v1401_v3 }
 0x31f   :  { %v930_v54 = vpop.f32.mrf.mxu1 }
 0x320   :  { %v811_v58 = vadd.f32 %v1040_v57, %v773_v30  ;;  %v931_v11 = vadd.f32 %v930_v54, %v929_v23 }
 0x321   :  { %v932_v59 = vpop.f32.mrf.mxu1 }
 0x322   :  { %827 = vst [vmem:[#allocation10 + $0x40] sm:$0xff] %v811_v58  ;;  %v776_v60 = vadd.f32 %v931_v11, %v1401_v3 }
 0x323   :  { %v933_v10 = vpop.f32.mrf.mxu1 }
 0x324   :  { %v812_v62 = vadd.f32 %v1041_v61, %v776_v60  ;;  %v934_v63 = vadd.f32 %v933_v10, %v932_v59 }
 0x325   :  { %v935_v2 = vpop.f32.mrf.mxu1 }
 0x326   :  { %828 = vst [vmem:[#allocation10 + $0x48] sm:$0xff] %v812_v62  ;;  %v781_v13 = vadd.f32 %v934_v63, %v1401_v3 }
 0x327   :  { %v936_v4 = vpop.f32.mrf.mxu1 }
 0x328   :  { %v813_v9 = vadd.f32 %v1042_v25, %v781_v13  ;;  %v937_v5 = vadd.f32 %v936_v4, %v935_v2 }
 0x329   :  { %v938_v38 = vpop.f32.mrf.mxu1 }
 0x32a   :  { %829 = vst [vmem:[#allocation10 + $0x50] sm:$0xff] %v813_v9  ;;  %v784_v21 = vadd.f32 %v937_v5, %v1401_v3 }
 0x32b   :  { %v939_v8 = vpop.f32.mrf.mxu1 }
 0x32c   :  { %v814_v6 = vadd.f32 %v1043_v36, %v784_v21  ;;  %v940_v37 = vadd.f32 %v939_v8, %v938_v38 }
 0x32d   :  { %v941_v7 = vpop.f32.mrf.mxu1 }
 0x32e   :  { %830 = vst [vmem:[#allocation10 + $0x58] sm:$0xff] %v814_v6  ;;  %v789_v15 = vadd.f32 %v940_v37, %v1401_v3 }
 0x32f   :  { %v942_v16 = vpop.f32.mrf.mxu1 }
 0x330   :  { %v815_v18 = vadd.f32 %v1044_v17, %v789_v15  ;;  %v943_v19 = vadd.f32 %v942_v16, %v941_v7 }
 0x331   :  { %v944_v20 = vpop.f32.mrf.mxu1 }
 0x332   :  { %831 = vst [vmem:[#allocation10 + $0x60] sm:$0xff] %v815_v18  ;;  %v792_v24 = vadd.f32 %v943_v19, %v1401_v3 }
 0x333   :  { %v945_v12 = vpop.f32.mrf.mxu1 }
 0x334   :  { %v816_v27 = vadd.f32 %v1045_v26, %v792_v24  ;;  %v946_v46 = vadd.f32 %v945_v12, %v944_v20 }
 0x335   :  { %v947_v28 = vpop.f32.mrf.mxu1 }
 0x336   :  { %832 = vst [vmem:[#allocation10 + $0x68] sm:$0xff] %v816_v27  ;;  %v797_v45 = vadd.f32 %v946_v46, %v1401_v3 }
 0x337   :  { %v948_v31 = vpop.f32.mrf.mxu1 }
 0x338   :  { %v817_v32 = vadd.f32 %v1046_v14, %v797_v45  ;;  %v949_v33 = vadd.f32 %v948_v31, %v947_v28 }
 0x33a   :  { %833 = vst [vmem:[#allocation10 + $0x70] sm:$0xff] %v817_v32  ;;  %v800_v34 = vadd.f32 %v949_v33, %v1401_v3 }
 0x33c   :  { %v818_v22 = vadd.f32 %v1047_v35, %v800_v34 }
 0x33e   :  { %834 = vst [vmem:[#allocation10 + $0x78] sm:$0xff] %v818_v22 }
 0x33f   :  { %1139 = shalt.err (!%p1136_p10)
}
 0x340   :  { %846 = dma.vmem_to_hbm [thread:$0]  %s841_s3, 2048, %s1429_s4, [#allocation4], %s1158_s23, %s1158_s23, %s1159_s24  }
 0x341   :  { %1154 = dma.done.wait [#allocation4], 2048  }
 0x342   :  { %1155 = vsyncadd [#allocation4], 4294965248 }
 0x343   :  { %850 = vsyncpa [#allocation3], 1 }
 0x344   :  { %851 = vsyncpa [#allocation6], 1 }
 0x345   :  { %852 = vsyncpa [#allocation9], 1 }
 0x346   :  { %853 = vsyncpa [#allocation4], 1 }

// kernel: tpu_custom_call.1
= control target key start
LH: loop header
LB: loop body
LE: loop exit
PB: predicated region body
PF: predicated region fallthrough
CT: control target
= control target key end

     0   :  { %9 = vsyncpa [#allocation3], 0  ;;  %s1425_s0 = inlined_call_operand.hbm [shape: f32[128,128], index: 0, kind: input, shape index: {}]   ;;  %s1426_s1 = inlined_call_operand.hbm [shape: f32[8,256], index: 1, kind: input, shape index: {}]   ;;  %s1427_s2 = inlined_call_operand.hbm [shape: bf16[128,256], index: 2, kind: input, shape index: {}]   ;;  %s1428_s3 = inlined_call_operand.hbm [shape: bf16[256,128], index: 3, kind: input, shape index: {}]   ;;  %s1429_s4 = inlined_call_operand.hbm [shape: f32[128,128], index: 4, kind: output, shape index: {}]  }
   0x1   :  { %10 = vsyncpa [#allocation6], 0 }
   0x2   :  { %11 = vsyncpa [#allocation9], 0 }
   0x3   :  { %12 = vsyncpa [#allocation4], 0  ;;  %s1156_s15 = smov [#allocation5]   ;;  %s1157_s17 = smov [#allocation2]  }
   0x4   :  { %s31_s16 = sshll.u32 %s1156_s15, 4  ;;  %s18_s18 = sshll.u32 %s1157_s17, 4  ;;  %s32_s16 = int_to_ptr.vmem [resolvable:$true] %s31_s16  ;;  %s19_s18 = int_to_ptr.vmem [resolvable:$true] %s18_s18 }
   0x5   :  { %s1056_s19 = scalar_lea.vmem %s32_s16, 256  ;;  %p1061_p1 = scmp.lt.s32.totalorder %s32_s16, %s32_s16 }
   0x6   :  { %p1057_p0 = scmp.ne.s32.totalorder %s32_s16, %s1056_s19  ;;  %p1062_p2 = scmp.lt.s32.totalorder %s1056_s19, %s1056_s19 }
   0x8   :  { %p1063_p3 = por %p1062_p2, %p1061_p1 }
   0xa   :  { %p1064_p4 = pnand %p1063_p3, %p1057_p0 }
   0xc   :  { %1067 = shalt.err (!%p1064_p4)
}
   0xd   :  { %34 = dma.hbm_to_vmem [thread:$0]  %s1426_s1, 256, %s32_s16, [#allocation6]  }
   0xe   :  { %s1076_s22 = scalar_lea.vmem %s19_s18, 2048  ;;  %p1081_p6 = scmp.lt.s32.totalorder %s19_s18, %s19_s18 }
   0xf   :  { %p1077_p5 = scmp.ne.s32.totalorder %s19_s18, %s1076_s22  ;;  %p1082_p7 = scmp.lt.s32.totalorder %s1076_s22, %s1076_s22 }
  0x11   :  { %p1083_p8 = por %p1082_p7, %p1081_p6 }
  0x13   :  { %p1084_p9 = pnand %p1083_p8, %p1077_p5 }
  0x15   :  { %1087 = shalt.err (!%p1084_p9)
}
  0x16   :  { %s1158_s23 = smov 128   ;;  %s1159_s24 = smov 8  }
  0x17   :  { %24 = dma.hbm_to_vmem [thread:$0]  %s1425_s0, 2048, %s19_s18, [#allocation3], %s1158_s23, %s1158_s23, %s1159_s24  }
  0x18   :  { %s1160_s27 = smov [#allocation7]   ;;  %s1161_s29 = smov [#allocation8]  }
  0x19   :  { %s40_s28 = sshll.u32 %s1160_s27, 4  ;;  %s52_s1 = sshll.u32 %s1161_s29, 4  ;;  %s41_s28 = int_to_ptr.vmem [resolvable:$true] %s40_s28  ;;  %s53_s1 = int_to_ptr.vmem [resolvable:$true] %s52_s1 }
  0x1a   :  { %s1096_s30 = scalar_lea.vmem %s41_s28, 2048  ;;  %p1101_p11 = scmp.lt.s32.totalorder %s41_s28, %s41_s28 }
  0x1b   :  { %p1097_p10 = scmp.ne.s32.totalorder %s41_s28, %s1096_s30  ;;  %p1102_p12 = scmp.lt.s32.totalorder %s1096_s30, %s1096_s30 }
  0x1d   :  { %p1103_p13 = por %p1102_p12, %p1101_p11 }
  0x1f   :  { %p1104_p0 = pnand %p1103_p13, %p1097_p10 }
  0x21   :  { %1107 = shalt.err (!%p1104_p0)
}
  0x22   :  { %46 = dma.hbm_to_vmem [thread:$0]  %s1427_s2, 2048, %s41_s28, [#allocation6], %s1158_s23, %s1158_s23, %s1159_s24  }
  0x23   :  { %s1116_s0 = scalar_lea.vmem %s53_s1, 2048  ;;  %p1121_p2 = scmp.lt.s32.totalorder %s53_s1, %s53_s1 }
  0x24   :  { %p1117_p1 = scmp.ne.s32.totalorder %s53_s1, %s1116_s0  ;;  %p1122_p3 = scmp.lt.s32.totalorder %s1116_s0, %s1116_s0 }
  0x26   :  { %p1123_p4 = por %p1122_p3, %p1121_p2 }
  0x28   :  { %p1124_p5 = pnand %p1123_p4, %p1117_p1 }
  0x2a   :  { %1127 = shalt.err (!%p1124_p5)
}
  0x2b   :  { %s1162_s7 = smov 64   ;;  %s1163_s8 = smov 4  }
  0x2c   :  { %58 = dma.hbm_to_vmem [thread:$0]  %s1428_s3, 2048, %s53_s1, [#allocation9], %s1162_s7, %s1162_s7, %s1163_s8  }
  0x2d   :  { %1148 = dma.done.wait [#allocation3], 2048  }
  0x2e   :  { %1149 = vsyncadd [#allocation3], 4294965248 }
  0x2f   :  { %1150 = dma.done.wait [#allocation6], 2304  }
  0x30   :  { %1151 = vsyncadd [#allocation6], 4294964992 }
  0x31   :  { %1152 = dma.done.wait [#allocation9], 2048  }
  0x32   :  { %1153 = vsyncadd [#allocation9], 4294965248  ;;  %v72_v0 = vld [vmem:[#allocation2] sm:$0xff]  ;;  %v74_v1 = vld [vmem:[#allocation2 + $0x10] sm:$0xff]  ;;  %s1165_s2 = smov [#allocation10]  }
  0x33   :  { %88 = vadd.xlane.f32.xlu0 %v72_v0  ;;  %92 = vadd.xlane.f32.xlu1 %v74_v1  ;;  %v73_v2 = vld [vmem:[#allocation2 + $0x8] sm:$0xff]  ;;  %v75_v3 = vld [vmem:[#allocation2 + $0x18] sm:$0xff]  ;;  %v76_v4 = vld [vmem:[#allocation2 + $0x20] sm:$0xff]  ;;  %s840_s3 = sshll.u32 %s1165_s2, 4  ;;  %s841_s3 = int_to_ptr.vmem [resolvable:$true] %s840_s3 }
  0x34   :  { %v77_v5 = vld [vmem:[#allocation2 + $0x28] sm:$0xff]  ;;  %v78_v6 = vld [vmem:[#allocation2 + $0x30] sm:$0xff]  ;;  %v79_v7 = vld [vmem:[#allocation2 + $0x38] sm:$0xff]  ;;  %s1128_s11 = scalar_lea.vmem %s841_s3, 2048  ;;  %p1133_p7 = scmp.lt.s32.totalorder %s841_s3, %s841_s3 }
  0x35   :  { %v1209_v8 = vld [vmem:[#allocation2 + $0x40] sm:$0xff]  ;;  %v1211_v9 = vld [vmem:[#allocation2 + $0x48] sm:$0xff]  ;;  %v1213_v10 = vld [vmem:[#allocation2 + $0x50] sm:$0xff]  ;;  %p1129_p6 = scmp.ne.s32.totalorder %s841_s3, %s1128_s11  ;;  %p1134_p8 = scmp.lt.s32.totalorder %s1128_s11, %s1128_s11 }
  0x36   :  { %v1215_v11 = vld [vmem:[#allocation2 + $0x58] sm:$0xff]  ;;  %v1221_v12 = vld [vmem:[#allocation2 + $0x60] sm:$0xff]  ;;  %v1223_v13 = vld [vmem:[#allocation2 + $0x68] sm:$0xff] }
  0x37   :  { %90 = vadd.xlane.f32.xlu0 %v73_v2  ;;  %94 = vadd.xlane.f32.xlu1 %v75_v3  ;;  %v1227_v14 = vld [vmem:[#allocation2 + $0x70] sm:$0xff]  ;;  %v1229_v15 = vld [vmem:[#allocation2 + $0x78] sm:$0xff]  ;;  %v960_v16 = vld [vmem:[#allocation7 + $0x74] ss:$8 sps:$4 sm:$0xff]   ;;  %p1135_p9 = por %p1134_p8, %p1133_p7 }
  0x38   :  { %v962_v17 = vld [vmem:[#allocation7 + $0x70] ss:$8 sps:$4 sm:$0xff]   ;;  %417 = vmatprep.subr.bf16.mxu0 %v960_v16  ;;  %v963_v53 = vld [vmem:[#allocation7 + $0x64] ss:$8 sps:$4 sm:$0xff]   ;;  %v965_v54 = vld [vmem:[#allocation7 + $0x60] ss:$8 sps:$4 sm:$0xff]  }
  0x39   :  { %418 = vmatpush1.bf16.msra.mxu0 %v962_v17  ;;  %v966_v63 = vld [vmem:[#allocation7 + $0x54] ss:$8 sps:$4 sm:$0xff]   ;;  %v971_v17 = vld [vmem:[#allocation7 + $0x40] ss:$8 sps:$4 sm:$0xff]   ;;  %p1136_p10 = pnand %p1135_p9, %p1129_p6 }
  0x3a   :  { %419 = vmatprep.subr.bf16.mxu0 %v963_v53 }
  0x3b   :  { %96 = vadd.xlane.f32.xlu0 %v76_v4  ;;  %98 = vadd.xlane.f32.xlu1 %v77_v5 }
  0x3d   :  { %420 = vmatpush1.bf16.msra.mxu0 %v965_v54 }
  0x3e   :  { %421 = vmatprep.subr.bf16.mxu0 %v966_v63 }
  0x3f   :  { %100 = vadd.xlane.f32.xlu0 %v78_v6  ;;  %102 = vadd.xlane.f32.xlu1 %v79_v7 }
  0x43   :  { %104 = vadd.xlane.f32.xlu0 %v1209_v8  ;;  %106 = vadd.xlane.f32.xlu1 %v1211_v9 }
  0x47   :  { %108 = vadd.xlane.f32.xlu0 %v1213_v10  ;;  %110 = vadd.xlane.f32.xlu1 %v1215_v11 }
  0x4b   :  { %112 = vadd.xlane.f32.xlu0 %v1221_v12  ;;  %114 = vadd.xlane.f32.xlu1 %v1223_v13 }
  0x4f   :  { %116 = vadd.xlane.f32.xlu0 %v1227_v14  ;;  %118 = vadd.xlane.f32.xlu1 %v1229_v15 }
  0xbc   :  { %v89_v18 = vpop.xlane.xlu0 %88  ;;  %v93_v19 = vpop.xlane.xlu1 %92 }
  0xbd   :  { %v121_v20 = vmul.f32 0.0078125, %v89_v18  ;;  %v123_v21 = vmul.f32 0.0078125, %v93_v19 }
  0xbf   :  { %v1233_v22 = vsub.f32 %v72_v0, %v121_v20  ;;  %v1235_v23 = vsub.f32 %v74_v1, %v123_v21 }
  0xc0   :  { %v91_v24 = vpop.xlane.xlu0 %90  ;;  %v95_v25 = vpop.xlane.xlu1 %94 }
  0xc1   :  { %v122_v26 = vmul.f32 0.0078125, %v91_v24  ;;  %v153_v27 = vmul.f32 %v1233_v22, %v1233_v22  ;;  %v124_v28 = vmul.f32 0.0078125, %v95_v25  ;;  %v155_v31 = vmul.f32 %v1235_v23, %v1235_v23 }
  0xc3   :  { %v1239_v29 = vsub.f32 %v73_v2, %v122_v26  ;;  %169 = vadd.xlane.f32.xlu0 %v153_v27  ;;  %v1241_v30 = vsub.f32 %v75_v3, %v124_v28  ;;  %v968_v3 = vld [vmem:[#allocation7 + $0x50] ss:$8 sps:$4 sm:$0xff]  }
  0xc4   :  { %v97_v32 = vpop.xlane.xlu0 %96  ;;  %v99_v33 = vpop.xlane.xlu1 %98  ;;  %422 = vmatpush1.bf16.msra.mxu0 %v968_v3  ;;  %v974_v27 = vld [vmem:[#allocation7 + $0x30] ss:$8 sps:$4 sm:$0xff]  }
  0xc5   :  { %v125_v34 = vmul.f32 0.0078125, %v97_v32  ;;  %v154_v35 = vmul.f32 %v1239_v29, %v1239_v29  ;;  %v126_v36 = vmul.f32 0.0078125, %v99_v33  ;;  %v156_v39 = vmul.f32 %v1241_v30, %v1241_v30  ;;  %v977_v32 = vld [vmem:[#allocation7 + $0x20] ss:$8 sps:$4 sm:$0xff]   ;;  %v980_v33 = vld [vmem:[#allocation7 + $0x10] ss:$8 sps:$4 sm:$0xff]  }
  0xc7   :  { %v1247_v37 = vsub.f32 %v76_v4, %v125_v34  ;;  %173 = vadd.xlane.f32.xlu0 %v155_v31  ;;  %171 = vadd.xlane.f32.xlu1 %v154_v35  ;;  %v1249_v38 = vsub.f32 %v77_v5, %v126_v36  ;;  %v975_v31 = vld [vmem:[#allocation7 + $0x24] ss:$8 sps:$4 sm:$0xff]   ;;  %v983_v35 = vld [vmem:[#allocation7] ss:$8 sps:$4 sm:$0xff]   ;;  %v1164_v36 = vmov 0  }
  0xc8   :  { %v101_v40 = vpop.xlane.xlu0 %100  ;;  %v103_v41 = vpop.xlane.xlu1 %102  ;;  %v981_v34 = vld [vmem:[#allocation7 + $0x4] ss:$8 sps:$4 sm:$0xff]   ;;  %449 = vmatprep.mubr.bf16.mxu0 %v1164_v36 }
  0xc9   :  { %v127_v42 = vmul.f32 0.0078125, %v101_v40  ;;  %v157_v43 = vmul.f32 %v1247_v37, %v1247_v37  ;;  %v128_v44 = vmul.f32 0.0078125, %v103_v41  ;;  %v158_v47 = vmul.f32 %v1249_v38, %v1249_v38  ;;  %v985_v40 = vld [vmem:[#allocation8 + $0x38] sm:$0xff]   ;;  %v986_v41 = vld [vmem:[#allocation8 + $0x70] sm:$0xff]  }
  0xcb   :  { %v1255_v45 = vsub.f32 %v78_v6, %v127_v42  ;;  %175 = vadd.xlane.f32.xlu1 %v156_v39  ;;  %177 = vadd.xlane.f32.xlu0 %v157_v43  ;;  %v1257_v46 = vsub.f32 %v79_v7, %v128_v44  ;;  %v984_v39 = vld [vmem:[#allocation8 + $0x78] sm:$0xff]   ;;  %v987_v42 = vld [vmem:[#allocation8 + $0x30] sm:$0xff]   ;;  %v988_v43 = vld [vmem:[#allocation8 + $0x68] sm:$0xff]  }
  0xcc   :  { %v105_v48 = vpop.xlane.xlu0 %104  ;;  %v107_v49 = vpop.xlane.xlu1 %106  ;;  %886 = vmatprep.subr.bf16.mxu1 %v984_v39  ;;  %v989_v44 = vld [vmem:[#allocation8 + $0x28] sm:$0xff]  }
  0xcd   :  { %v129_v50 = vmul.f32 0.0078125, %v105_v48  ;;  %v159_v51 = vmul.f32 %v1255_v45, %v1255_v45  ;;  %v130_v52 = vmul.f32 0.0078125, %v107_v49  ;;  %v160_v57 = vmul.f32 %v1257_v46, %v1257_v46  ;;  %887 = vmatpush3.bf16.msra.mxu1 %v985_v40  ;;  %v991_v48 = vld [vmem:[#allocation8 + $0x20] sm:$0xff]   ;;  %v992_v49 = vld [vmem:[#allocation8 + $0x58] sm:$0xff]  }
  0xce   :  { %888 = vmatprep.subr.bf16.mxu1 %v986_v41 }
  0xcf   :  { %v1264_v55 = vsub.f32 %v1209_v8, %v129_v50  ;;  %179 = vadd.xlane.f32.xlu1 %v158_v47  ;;  %181 = vadd.xlane.f32.xlu0 %v159_v51  ;;  %v1267_v56 = vsub.f32 %v1211_v9, %v130_v52  ;;  %v969_v9 = vld [vmem:[#allocation7 + $0x44] ss:$8 sps:$4 sm:$0xff]   ;;  %v993_v50 = vld [vmem:[#allocation8 + $0x18] sm:$0xff]  }
  0xd0   :  { %v109_v58 = vpop.xlane.xlu0 %108  ;;  %v111_v59 = vpop.xlane.xlu1 %110  ;;  %423 = vmatprep.subr.bf16.mxu0 %v969_v9  ;;  %v990_v47 = vld [vmem:[#allocation8 + $0x60] sm:$0xff]  }
  0xd1   :  { %v131_v60 = vmul.f32 0.0078125, %v109_v58  ;;  %v161_v61 = vmul.f32 %v1264_v55, %v1264_v55  ;;  %v132_v62 = vmul.f32 0.0078125, %v111_v59  ;;  %v162_v2 = vmul.f32 %v1267_v56, %v1267_v56  ;;  %424 = vmatpush1.bf16.msra.mxu0 %v971_v17  ;;  %889 = vmatpush3.bf16.msra.mxu1 %v987_v42 }
  0xd2   :  { %890 = vmatprep.subr.bf16.mxu1 %v988_v43 }
  0xd3   :  { %v1274_v0 = vsub.f32 %v1213_v10, %v131_v60  ;;  %183 = vadd.xlane.f32.xlu1 %v160_v57  ;;  %185 = vadd.xlane.f32.xlu0 %v161_v61  ;;  %v1277_v1 = vsub.f32 %v1215_v11, %v132_v62 }
  0xd4   :  { %v113_v4 = vpop.xlane.xlu0 %112  ;;  %v115_v5 = vpop.xlane.xlu1 %114 }
  0xd5   :  { %v133_v6 = vmul.f32 0.0078125, %v113_v4  ;;  %v163_v7 = vmul.f32 %v1274_v0, %v1274_v0  ;;  %v134_v8 = vmul.f32 0.0078125, %v115_v5  ;;  %v164_v16 = vmul.f32 %v1277_v1, %v1277_v1  ;;  %891 = vmatpush3.bf16.msra.mxu1 %v989_v44 }
  0xd6   :  { %892 = vmatprep.subr.bf16.mxu1 %v990_v47 }
  0xd7   :  { %v1284_v10 = vsub.f32 %v1221_v12, %v133_v6  ;;  %187 = vadd.xlane.f32.xlu1 %v162_v2  ;;  %189 = vadd.xlane.f32.xlu0 %v163_v7  ;;  %v1287_v11 = vsub.f32 %v1223_v13, %v134_v8  ;;  %v972_v12 = vld [vmem:[#allocation7 + $0x34] ss:$8 sps:$4 sm:$0xff]  }
  0xd8   :  { %v117_v18 = vpop.xlane.xlu0 %116  ;;  %v119_v19 = vpop.xlane.xlu1 %118  ;;  %425 = vmatprep.subr.bf16.mxu0 %v972_v12 }
  0xd9   :  { %v135_v20 = vmul.f32 0.0078125, %v117_v18  ;;  %v165_v21 = vmul.f32 %v1284_v10, %v1284_v10  ;;  %v136_v24 = vmul.f32 0.0078125, %v119_v19  ;;  %v166_v26 = vmul.f32 %v1287_v11, %v1287_v11  ;;  %426 = vmatpush1.bf16.msra.mxu0 %v974_v27  ;;  %893 = vmatpush3.bf16.msra.mxu1 %v991_v48 }
  0xda   :  { %427 = vmatprep.subr.bf16.mxu0 %v975_v31  ;;  %894 = vmatprep.subr.bf16.mxu1 %v992_v49 }
  0xdb   :  { %v1294_v25 = vsub.f32 %v1227_v14, %v135_v20  ;;  %191 = vadd.xlane.f32.xlu1 %v164_v16  ;;  %193 = vadd.xlane.f32.xlu0 %v165_v21  ;;  %v1297_v13 = vsub.f32 %v1229_v15, %v136_v24  ;;  %v978_v15 = vld [vmem:[#allocation7 + $0x14] ss:$8 sps:$4 sm:$0xff]   ;;  %v1307_v21 = vld [vmem:[#allocation5] ss:$0 sm:$0xff] }
  0xdd   :  { %v167_v28 = vmul.f32 %v1294_v25, %v1294_v25  ;;  %v168_v14 = vmul.f32 %v1297_v13, %v1297_v13  ;;  %428 = vmatpush1.bf16.msra.mxu0 %v977_v32  ;;  %895 = vmatpush3.bf16.msra.mxu1 %v993_v50 }
  0xde   :  { %429 = vmatprep.subr.bf16.mxu0 %v978_v15  ;;  %v1311_v15 = vld [vmem:[#allocation5 + $0x1] ss:$0 sm:$0xff] }
  0xdf   :  { %195 = vadd.xlane.f32.xlu1 %v166_v26  ;;  %197 = vadd.xlane.f32.xlu0 %v167_v28 }
  0xe1   :  { %430 = vmatpush1.bf16.msra.mxu0 %v980_v33 }
  0xe2   :  { %431 = vmatprep.subr.bf16.mxu0 %v981_v34 }
  0xe3   :  { %199 = vadd.xlane.f32.xlu1 %v168_v14 }
  0xe5   :  { %432 = vmatpush1.bf16.msra.mxu0 %v983_v35 }
 0x14c   :  { %v170_v51 = vpop.xlane.xlu0 %169 }
 0x14d   :  { %v201_v52 = vmul.f32 0.0078125, %v170_v51 }
 0x14f   :  { %v219_v53 = vadd.f32 1e-05, %v201_v52 }
 0x150   :  { %v172_v54 = vpop.xlane.xlu1 %171  ;;  %v174_v57 = vpop.xlane.xlu0 %173 }
 0x151   :  { %1000 = vrsqrt.f32 %v219_v53  ;;  %v202_v58 = vmul.f32 0.0078125, %v172_v54  ;;  %v203_v59 = vmul.f32 0.0078125, %v174_v57 }
 0x153   :  { %v220_v60 = vadd.f32 1e-05, %v202_v58  ;;  %v221_v61 = vadd.f32 1e-05, %v203_v59 }
 0x154   :  { %v176_v62 = vpop.xlane.xlu1 %175  ;;  %v178_v63 = vpop.xlane.xlu0 %177 }
 0x155   :  { %1002 = vrsqrt.f32 %v220_v60  ;;  %v204_v2 = vmul.f32 0.0078125, %v176_v62  ;;  %v205_v4 = vmul.f32 0.0078125, %v178_v63 }
 0x156   :  { %1004 = vrsqrt.f32 %v221_v61 }
 0x157   :  { %v222_v3 = vadd.f32 1e-05, %v204_v2  ;;  %v223_v7 = vadd.f32 1e-05, %v205_v4 }
 0x158   :  { %v180_v5 = vpop.xlane.xlu1 %179  ;;  %v182_v9 = vpop.xlane.xlu0 %181 }
 0x159   :  { %1006 = vrsqrt.f32 %v222_v3  ;;  %v206_v6 = vmul.f32 0.0078125, %v180_v5  ;;  %v207_v19 = vmul.f32 0.0078125, %v182_v9 }
 0x15b   :  { %v224_v8 = vadd.f32 1e-05, %v206_v6  ;;  %v225_v26 = vadd.f32 1e-05, %v207_v19 }
 0x15c   :  { %v184_v16 = vpop.xlane.xlu1 %183  ;;  %v186_v28 = vpop.xlane.xlu0 %185 }
 0x15d   :  { %1008 = vrsqrt.f32 %v224_v8  ;;  %v208_v17 = vmul.f32 0.0078125, %v184_v16 }
 0x15e   :  { %v1001_v18 = vpop.eup %1000  ;;  %1010 = vrsqrt.f32 %v223_v7 }
 0x15f   :  { %v251_v20 = vmul.f32 %v1001_v18, %v1233_v22  ;;  %v226_v24 = vadd.f32 1e-05, %v208_v17  ;;  %v209_v22 = vmul.f32 0.0078125, %v186_v28 }
 0x160   :  { %v188_v27 = vpop.xlane.xlu1 %187  ;;  %v190_v52 = vpop.xlane.xlu0 %189 }
 0x161   :  { %v267_v14 = vmul.f32 %v251_v20, %v1307_v21  ;;  %1012 = vrsqrt.f32 %v226_v24  ;;  %v210_v33 = vmul.f32 0.0078125, %v188_v27  ;;  %v227_v49 = vadd.f32 1e-05, %v209_v22 }
 0x162   :  { %v1003_v12 = vpop.eup %1002  ;;  %1014 = vrsqrt.f32 %v225_v26  ;;  %v211_v54 = vmul.f32 0.0078125, %v190_v52 }
 0x163   :  { %v252_v31 = vmul.f32 %v1003_v12, %v1239_v29  ;;  %v1005_v32 = vpop.eup %1004  ;;  %v283_v39 = vadd.f32 %v267_v14, %v1311_v15  ;;  %v228_v42 = vadd.f32 1e-05, %v210_v33 }
 0x164   :  { %v253_v41 = vmul.f32 %v1005_v32, %v1235_v23  ;;  %v192_v47 = vpop.xlane.xlu1 %191  ;;  %v229_v3 = vadd.f32 1e-05, %v211_v54  ;;  %v194_v5 = vpop.xlane.xlu0 %193 }
 0x165   :  { %v268_v34 = vmul.f32 %v252_v31, %v1307_v21  ;;  %1016 = vrsqrt.f32 %v228_v42  ;;  %v212_v53 = vmul.f32 0.0078125, %v192_v47  ;;  %v213_v7 = vmul.f32 0.0078125, %v194_v5  ;;  %v998_v5 = vld [vmem:[#allocation8 + $0x40] sm:$0xff]  }
 0x166   :  { %v1007_v35 = vpop.eup %1006  ;;  %v269_v50 = vmul.f32 %v253_v41, %v1307_v21  ;;  %1018 = vrsqrt.f32 %v227_v49 }
 0x167   :  { %v284_v40 = vadd.f32 %v268_v34, %v1311_v15  ;;  %v254_v29 = vmul.f32 %v1007_v35, %v1241_v30  ;;  %v230_v59 = vadd.f32 1e-05, %v212_v53  ;;  %v231_v24 = vadd.f32 1e-05, %v213_v7 }
 0x168   :  { %v285_v57 = vadd.f32 %v269_v50, %v1311_v15  ;;  %v196_v63 = vpop.xlane.xlu1 %195  ;;  %v198_v27 = vpop.xlane.xlu0 %197  ;;  %v301_v7 = vld [vmem:[#allocation5 + $0x3] ss:$8 sm:$0x3] }
 0x169   :  { %v302_v43 = vpack.c.bf16 %v284_v40, %v283_v39  ;;  %v270_v48 = vmul.f32 %v254_v29, %v1307_v21  ;;  %1020 = vrsqrt.f32 %v230_v59  ;;  %v215_v31 = vmul.f32 0.0078125, %v198_v27 }
 0x16a   :  { %v1009_v44 = vpop.eup %1008  ;;  %1022 = vrsqrt.f32 %v229_v3  ;;  %v994_v3 = vld [vmem:[#allocation8 + $0x50] sm:$0xff]  }
 0x16b   :  { %450 = vmatmul.mubr.bf16.vlgmr.msra.gmra.mxu0 %v302_v43  ;;  %v1011_v51 = vpop.eup %1010  ;;  %v286_v23 = vadd.f32 %v270_v48, %v1311_v15  ;;  %v256_v30 = vmul.f32 %v1009_v44, %v1249_v38  ;;  %v214_v38 = vmul.f32 0.0078125, %v196_v63  ;;  %v233_v39 = vadd.f32 1e-05, %v215_v31  ;;  %896 = vmatprep.subr.bf16.mxu1 %v994_v3 }
 0x16c   :  { %459 = vmatprep.mubr.bf16.mxu0 %v1164_v36  ;;  %v255_v58 = vmul.f32 %v1011_v51, %v1247_v37  ;;  %v200_v20 = vpop.xlane.xlu1 %199 }
 0x16d   :  { %v303_v60 = vpack.c.bf16 %v286_v23, %v285_v57  ;;  %v272_v61 = vmul.f32 %v256_v30, %v1307_v21  ;;  %v232_v16 = vadd.f32 1e-05, %v214_v38  ;;  %v999_v38 = vld [vmem:[#allocation8] sm:$0xff]  }
 0x16e   :  { %v1013_v62 = vpop.eup %1012  ;;  %v271_v4 = vmul.f32 %v255_v58, %v1307_v21 }
 0x16f   :  { %v1015_v2 = vpop.eup %1014  ;;  %v288_v6 = vadd.f32 %v272_v61, %v1311_v15  ;;  %v258_v37 = vmul.f32 %v1013_v62, %v1257_v46  ;;  %1024 = vrsqrt.f32 %v232_v16  ;;  %v216_v46 = vmul.f32 0.0078125, %v200_v20 }
 0x170   :  { %v287_v8 = vadd.f32 %v271_v4, %v1311_v15  ;;  %v257_v9 = vmul.f32 %v1015_v2, %v1255_v45  ;;  %1026 = vrsqrt.f32 %v231_v24  ;;  %v996_v4 = vld [vmem:[#allocation8 + $0x48] sm:$0xff]  }
 0x171   :  { %v274_v18 = vmul.f32 %v258_v37, %v1307_v21  ;;  %v234_v33 = vadd.f32 1e-05, %v216_v46 }
 0x172   :  { %v304_v17 = vpack.c.bf16 %v288_v6, %v287_v8  ;;  %v1017_v19 = vpop.eup %1016  ;;  %v273_v12 = vmul.f32 %v257_v9, %v1307_v21 }
 0x173   :  { %460 = vmatmul.mubr.bf16.gmra.mxu0 %v303_v60  ;;  %v1019_v26 = vpop.eup %1018  ;;  %v290_v28 = vadd.f32 %v274_v18, %v1311_v15  ;;  %v260_v45 = vmul.f32 %v1017_v19, %v1267_v56  ;;  %1028 = vrsqrt.f32 %v234_v33 }
 0x174   :  { %469 = vmatprep.mubr.bf16.mxu0 %v1164_v36  ;;  %v289_v14 = vadd.f32 %v273_v12, %v1311_v15  ;;  %v259_v32 = vmul.f32 %v1019_v26, %v1264_v55  ;;  %1030 = vrsqrt.f32 %v233_v39 }
 0x175   :  { %v276_v35 = vmul.f32 %v260_v45, %v1307_v21 }
 0x176   :  { %v305_v34 = vpack.c.bf16 %v290_v28, %v289_v14  ;;  %v1021_v22 = vpop.eup %1020  ;;  %v275_v40 = vmul.f32 %v259_v32, %v1307_v21 }
 0x177   :  { %v1023_v41 = vpop.eup %1022  ;;  %v292_v56 = vadd.f32 %v276_v35, %v1311_v15  ;;  %v262_v29 = vmul.f32 %v1021_v22, %v1277_v1 }
 0x178   :  { %v291_v55 = vadd.f32 %v275_v40, %v1311_v15  ;;  %v261_v42 = vmul.f32 %v1023_v41, %v1274_v0 }
 0x179   :  { %v278_v44 = vmul.f32 %v262_v29, %v1307_v21 }
 0x17a   :  { %v306_v43 = vpack.c.bf16 %v292_v56, %v291_v55  ;;  %v277_v48 = vmul.f32 %v261_v42, %v1307_v21 }
 0x17b   :  { %470 = vmatmul.mubr.bf16.gmra.mxu0 %v304_v17  ;;  %v294_v50 = vadd.f32 %v278_v44, %v1311_v15 }
 0x17c   :  { %479 = vmatprep.mubr.bf16.mxu0 %v1164_v36  ;;  %v1025_v47 = vpop.eup %1024  ;;  %v293_v1 = vadd.f32 %v277_v48, %v1311_v15 }
 0x17d   :  { %v1027_v49 = vpop.eup %1026  ;;  %v264_v51 = vmul.f32 %v1025_v47, %v1287_v11 }
 0x17e   :  { %v263_v52 = vmul.f32 %v1027_v49, %v1284_v10  ;;  %v307_v53 = vpack.c.bf16 %v294_v50, %v293_v1 }
 0x17f   :  { %v280_v0 = vmul.f32 %v264_v51, %v1307_v21 }
 0x180   :  { %v1029_v23 = vpop.eup %1028  ;;  %v279_v30 = vmul.f32 %v263_v52, %v1307_v21 }
 0x181   :  { %v1031_v54 = vpop.eup %1030  ;;  %v296_v57 = vadd.f32 %v280_v0, %v1311_v15  ;;  %v266_v58 = vmul.f32 %v1029_v23, %v1297_v13  ;;  %v995_v13 = vld [vmem:[#allocation8 + $0x10] sm:$0xff]  }
 0x182   :  { %v295_v11 = vadd.f32 %v279_v30, %v1311_v15  ;;  %v265_v59 = vmul.f32 %v1031_v54, %v1294_v25  ;;  %897 = vmatpush3.bf16.msra.mxu1 %v995_v13  ;;  %v997_v25 = vld [vmem:[#allocation8 + $0x8] sm:$0xff]  }
 0x183   :  { %480 = vmatmul.mubr.bf16.gmra.mxu0 %v305_v34  ;;  %v282_v10 = vmul.f32 %v266_v58, %v1307_v21  ;;  %898 = vmatprep.subr.bf16.mxu1 %v996_v4 }
 0x184   :  { %489 = vmatprep.mubr.bf16.mxu0 %v1164_v36  ;;  %v308_v60 = vpack.c.bf16 %v296_v57, %v295_v11  ;;  %v281_v61 = vmul.f32 %v265_v59, %v1307_v21  ;;  %v327_v21 = vlaneseq }
 0x185   :  { %v298_v62 = vadd.f32 %v282_v10, %v1311_v15 }
 0x186   :  { %v297_v63 = vadd.f32 %v281_v61, %v1311_v15  ;;  %899 = vmatpush3.bf16.msra.mxu1 %v997_v25 }
 0x187   :  { %900 = vmatprep.subr.bf16.mxu1 %v998_v5 }
 0x188   :  { %v309_v2 = vpack.c.bf16 %v298_v62, %v297_v63 }
 0x18a   :  { %901 = vmatpush3.bf16.msra.mxu1 %v999_v38 }
 0x18b   :  { %490 = vmatmul.mubr.bf16.gmra.mxu0 %v306_v43 }
 0x18c   :  { %499 = vmatprep.mubr.bf16.mxu0 %v1164_v36 }
 0x193   :  { %500 = vmatmul.mubr.bf16.gmra.mxu0 %v307_v53 }
 0x194   :  { %509 = vmatprep.mubr.bf16.mxu0 %v1164_v36 }
 0x19b   :  { %510 = vmatmul.mubr.bf16.gmra.mxu0 %v308_v60 }
 0x19c   :  { %519 = vmatprep.mubr.bf16.mxu0 %v1164_v36  ;;  %v328_v36 = vshrl.u32 %v327_v21, 7 }
 0x19e   :  { %v333_v6 = vsub.s32 1, %v328_v36  ;;  %v329_v37 = vsub.s32 0, %v328_v36 }
 0x1a0   :  { %v1365_v8 = vrot.slane %v301_v7, %v333_v6  ;;  %v1367_v9 = vrot.slane %v301_v7, %v329_v37 }
 0x1a3   :  { %520 = vmatmul.mubr.bf16.gmra.mxu0 %v309_v2 }
 0x22b   :  { %v451_v15 = vpop.f32.mrf.mxu0 }
 0x22c   :  { %v452_v20 = vadd.f32 %v451_v15, %v1367_v9 }
 0x22d   :  { %v453_v16 = vpop.f32.mrf.mxu0 }
 0x22e   :  { %v454_v18 = vadd.f32 %v453_v16, %v1365_v8  ;;  %v530_v45 = vmax.f32 %v452_v20, 0.0 }
 0x22f   :  { %v455_v17 = vpop.f32.mrf.mxu0 }
 0x230   :  { %v456_v19 = vadd.f32 %v455_v17, %v1367_v9  ;;  %v531_v46 = vmax.f32 %v454_v18, 0.0 }
 0x231   :  { %v457_v24 = vpop.f32.mrf.mxu0 }
 0x232   :  { %v458_v12 = vadd.f32 %v457_v24, %v1365_v8  ;;  %v532_v26 = vmax.f32 %v456_v19, 0.0 }
 0x233   :  { %v461_v27 = vpop.f32.mrf.mxu0 }
 0x234   :  { %v533_v28 = vmax.f32 %v458_v12, 0.0  ;;  %v562_v32 = vpack.c.bf16 %v532_v26, %v530_v45  ;;  %v462_v22 = vadd.f32 %v461_v27, %v1367_v9 }
 0x235   :  { %v463_v31 = vpop.f32.mrf.mxu0 }
 0x236   :  { %v563_v14 = vpack.c.bf16 %v533_v28, %v531_v46  ;;  %v464_v34 = vadd.f32 %v463_v31, %v1365_v8  ;;  %v534_v42 = vmax.f32 %v462_v22, 0.0 }
 0x237   :  { %v465_v33 = vpop.f32.mrf.mxu0 }
 0x238   :  { %v466_v35 = vadd.f32 %v465_v33, %v1367_v9  ;;  %738 = vmatprep.mubr.bf16.mxu1 %v563_v14  ;;  %v535_v29 = vmax.f32 %v464_v34, 0.0 }
 0x239   :  { %v467_v39 = vpop.f32.mrf.mxu0  ;;  %739 = vmatmul.mubr.bf16.vlgmr.msra.gmra.mxu1 %v562_v32 }
 0x23a   :  { %v468_v40 = vadd.f32 %v467_v39, %v1365_v8  ;;  %v536_v41 = vmax.f32 %v466_v35, 0.0 }
 0x23b   :  { %v471_v56 = vpop.f32.mrf.mxu0 }
 0x23c   :  { %v537_v55 = vmax.f32 %v468_v40, 0.0  ;;  %v564_v47 = vpack.c.bf16 %v536_v41, %v534_v42  ;;  %v472_v51 = vadd.f32 %v471_v56, %v1367_v9 }
 0x23d   :  { %v473_v43 = vpop.f32.mrf.mxu0 }
 0x23e   :  { %v565_v44 = vpack.c.bf16 %v537_v55, %v535_v29  ;;  %v474_v49 = vadd.f32 %v473_v43, %v1365_v8  ;;  %v538_v54 = vmax.f32 %v472_v51, 0.0 }
 0x23f   :  { %v475_v48 = vpop.f32.mrf.mxu0 }
 0x240   :  { %v476_v50 = vadd.f32 %v475_v48, %v1367_v9  ;;  %746 = vmatprep.mubr.bf16.mxu1 %v565_v44  ;;  %v539_v23 = vmax.f32 %v474_v49, 0.0 }
 0x241   :  { %v477_v1 = vpop.f32.mrf.mxu0  ;;  %747 = vmatmul.mubr.bf16.gmra.mxu1 %v564_v47 }
 0x242   :  { %v478_v52 = vadd.f32 %v477_v1, %v1365_v8  ;;  %v540_v53 = vmax.f32 %v476_v50, 0.0 }
 0x243   :  { %v481_v0 = vpop.f32.mrf.mxu0 }
 0x244   :  { %v541_v30 = vmax.f32 %v478_v52, 0.0  ;;  %v566_v11 = vpack.c.bf16 %v540_v53, %v538_v54  ;;  %v482_v61 = vadd.f32 %v481_v0, %v1367_v9 }
 0x245   :  { %v483_v57 = vpop.f32.mrf.mxu0 }
 0x246   :  { %v567_v58 = vpack.c.bf16 %v541_v30, %v539_v23  ;;  %v484_v60 = vadd.f32 %v483_v57, %v1365_v8  ;;  %v542_v25 = vmax.f32 %v482_v61, 0.0 }
 0x247   :  { %v485_v59 = vpop.f32.mrf.mxu0 }
 0x248   :  { %v486_v10 = vadd.f32 %v485_v59, %v1367_v9  ;;  %754 = vmatprep.mubr.bf16.mxu1 %v567_v58  ;;  %v543_v13 = vmax.f32 %v484_v60, 0.0 }
 0x249   :  { %v487_v62 = vpop.f32.mrf.mxu0  ;;  %755 = vmatmul.mubr.bf16.gmra.mxu1 %v566_v11 }
 0x24a   :  { %v488_v63 = vadd.f32 %v487_v62, %v1365_v8  ;;  %v544_v2 = vmax.f32 %v486_v10, 0.0 }
 0x24b   :  { %v491_v3 = vpop.f32.mrf.mxu0 }
 0x24c   :  { %v545_v4 = vmax.f32 %v488_v63, 0.0  ;;  %v568_v21 = vpack.c.bf16 %v544_v2, %v542_v25  ;;  %v492_v7 = vadd.f32 %v491_v3, %v1367_v9  ;;  %v1401_v3 = vld [vmem:[#allocation5 + $0x2] ss:$0 sm:$0xff] }
 0x24d   :  { %v493_v5 = vpop.f32.mrf.mxu0 }
 0x24e   :  { %v569_v38 = vpack.c.bf16 %v545_v4, %v543_v13  ;;  %v494_v6 = vadd.f32 %v493_v5, %v1365_v8  ;;  %v546_v24 = vmax.f32 %v492_v7, 0.0  ;;  %v1033_v7 = vld [vmem:[#allocation2 + $0x8] sm:$0xff] }
 0x24f   :  { %v495_v36 = vpop.f32.mrf.mxu0 }
 0x250   :  { %v496_v37 = vadd.f32 %v495_v36, %v1367_v9  ;;  %762 = vmatprep.mubr.bf16.mxu1 %v569_v38  ;;  %v547_v19 = vmax.f32 %v494_v6, 0.0  ;;  %v1032_v38 = vld [vmem:[#allocation2] sm:$0xff] }
 0x251   :  { %v497_v15 = vpop.f32.mrf.mxu0  ;;  %763 = vmatmul.mubr.bf16.gmra.mxu1 %v568_v21 }
 0x252   :  { %v498_v16 = vadd.f32 %v497_v15, %v1365_v8  ;;  %v548_v17 = vmax.f32 %v496_v37, 0.0 }
 0x253   :  { %v501_v18 = vpop.f32.mrf.mxu0 }
 0x254   :  { %v549_v20 = vmax.f32 %v498_v16, 0.0  ;;  %v570_v27 = vpack.c.bf16 %v548_v17, %v546_v24  ;;  %v502_v31 = vadd.f32 %v501_v18, %v1367_v9 }
 0x255   :  { %v503_v12 = vpop.f32.mrf.mxu0 }
 0x256   :  { %v571_v26 = vpack.c.bf16 %v549_v20, %v547_v19  ;;  %v504_v28 = vadd.f32 %v503_v12, %v1365_v8  ;;  %v550_v39 = vmax.f32 %v502_v31, 0.0  ;;  %v1034_v20 = vld [vmem:[#allocation2 + $0x10] sm:$0xff] }
 0x257   :  { %v505_v46 = vpop.f32.mrf.mxu0 }
 0x258   :  { %v506_v45 = vadd.f32 %v505_v46, %v1367_v9  ;;  %770 = vmatprep.mubr.bf16.mxu1 %v571_v26  ;;  %v551_v35 = vmax.f32 %v504_v28, 0.0  ;;  %v1035_v28 = vld [vmem:[#allocation2 + $0x18] sm:$0xff] }
 0x259   :  { %v507_v14 = vpop.f32.mrf.mxu0  ;;  %771 = vmatmul.mubr.bf16.gmra.mxu1 %v570_v27 }
 0x25a   :  { %v508_v32 = vadd.f32 %v507_v14, %v1365_v8  ;;  %v552_v33 = vmax.f32 %v506_v45, 0.0 }
 0x25b   :  { %v511_v34 = vpop.f32.mrf.mxu0 }
 0x25c   :  { %v553_v22 = vmax.f32 %v508_v32, 0.0  ;;  %v572_v56 = vpack.c.bf16 %v552_v33, %v550_v39  ;;  %v512_v43 = vadd.f32 %v511_v34, %v1367_v9  ;;  %v1036_v34 = vld [vmem:[#allocation2 + $0x20] sm:$0xff] }
 0x25d   :  { %v513_v40 = vpop.f32.mrf.mxu0 }
 0x25e   :  { %v573_v41 = vpack.c.bf16 %v553_v22, %v551_v35  ;;  %v514_v55 = vadd.f32 %v513_v40, %v1365_v8  ;;  %v554_v1 = vmax.f32 %v512_v43, 0.0 }
 0x25f   :  { %v515_v29 = vpop.f32.mrf.mxu0 }
 0x260   :  { %v516_v42 = vadd.f32 %v515_v29, %v1367_v9  ;;  %778 = vmatprep.mubr.bf16.mxu1 %v573_v41  ;;  %v555_v50 = vmax.f32 %v514_v55, 0.0 }
 0x261   :  { %v517_v44 = vpop.f32.mrf.mxu0  ;;  %779 = vmatmul.mubr.bf16.gmra.mxu1 %v572_v56  ;;  %v1037_v56 = vld [vmem:[#allocation2 + $0x28] sm:$0xff] }
 0x262   :  { %v518_v47 = vadd.f32 %v517_v44, %v1365_v8  ;;  %v556_v48 = vmax.f32 %v516_v42, 0.0 }
 0x263   :  { %v521_v49 = vpop.f32.mrf.mxu0 }
 0x264   :  { %v557_v51 = vmax.f32 %v518_v47, 0.0  ;;  %v574_v0 = vpack.c.bf16 %v556_v48, %v554_v1  ;;  %v522_v57 = vadd.f32 %v521_v49, %v1367_v9  ;;  %v1038_v47 = vld [vmem:[#allocation2 + $0x30] sm:$0xff] }
 0x265   :  { %v523_v52 = vpop.f32.mrf.mxu0 }
 0x266   :  { %v575_v53 = vpack.c.bf16 %v557_v51, %v555_v50  ;;  %v524_v30 = vadd.f32 %v523_v52, %v1365_v8  ;;  %v558_v61 = vmax.f32 %v522_v57, 0.0  ;;  %v1039_v52 = vld [vmem:[#allocation2 + $0x38] sm:$0xff]  ;;  %v1040_v57 = vld [vmem:[#allocation2 + $0x40] sm:$0xff] }
 0x267   :  { %v525_v23 = vpop.f32.mrf.mxu0 }
 0x268   :  { %v526_v54 = vadd.f32 %v525_v23, %v1367_v9  ;;  %786 = vmatprep.mubr.bf16.mxu1 %v575_v53  ;;  %v559_v60 = vmax.f32 %v524_v30, 0.0 }
 0x269   :  { %v527_v58 = vpop.f32.mrf.mxu0  ;;  %787 = vmatmul.mubr.bf16.gmra.mxu1 %v574_v0 }
 0x26a   :  { %v528_v11 = vadd.f32 %v527_v58, %v1365_v8  ;;  %v560_v59 = vmax.f32 %v526_v54, 0.0 }
 0x26c   :  { %v561_v10 = vmax.f32 %v528_v11, 0.0  ;;  %v576_v63 = vpack.c.bf16 %v560_v59, %v558_v61  ;;  %v1041_v61 = vld [vmem:[#allocation2 + $0x48] sm:$0xff] }
 0x26e   :  { %v577_v62 = vpack.c.bf16 %v561_v10, %v559_v60 }
 0x270   :  { %794 = vmatprep.mubr.bf16.mxu1 %v577_v62 }
 0x271   :  { %795 = vmatmul.mubr.bf16.gmra.mxu1 %v576_v63 }
 0x2f9   :  { %v902_v2 = vpop.f32.mrf.mxu1 }
 0x2fb   :  { %v903_v13 = vpop.f32.mrf.mxu1 }
 0x2fc   :  { %v904_v4 = vadd.f32 %v903_v13, %v902_v2 }
 0x2fd   :  { %v905_v25 = vpop.f32.mrf.mxu1 }
 0x2fe   :  { %v741_v9 = vadd.f32 %v904_v4, %v1401_v3 }
 0x2ff   :  { %v906_v5 = vpop.f32.mrf.mxu1 }
 0x300   :  { %v803_v21 = vadd.f32 %v1032_v38, %v741_v9  ;;  %v907_v8 = vadd.f32 %v906_v5, %v905_v25  ;;  %v1042_v25 = vld [vmem:[#allocation2 + $0x50] sm:$0xff] }
 0x301   :  { %v908_v36 = vpop.f32.mrf.mxu1 }
 0x302   :  { %819 = vst [vmem:[#allocation10] sm:$0xff] %v803_v21  ;;  %v744_v6 = vadd.f32 %v907_v8, %v1401_v3 }
 0x303   :  { %v909_v37 = vpop.f32.mrf.mxu1 }
 0x304   :  { %v804_v15 = vadd.f32 %v1033_v7, %v744_v6  ;;  %v910_v16 = vadd.f32 %v909_v37, %v908_v36  ;;  %v1043_v36 = vld [vmem:[#allocation2 + $0x58] sm:$0xff] }
 0x305   :  { %v911_v17 = vpop.f32.mrf.mxu1 }
 0x306   :  { %820 = vst [vmem:[#allocation10 + $0x8] sm:$0xff] %v804_v15  ;;  %v749_v18 = vadd.f32 %v910_v16, %v1401_v3 }
 0x307   :  { %v912_v19 = vpop.f32.mrf.mxu1 }
 0x308   :  { %v805_v24 = vadd.f32 %v1034_v20, %v749_v18  ;;  %v913_v12 = vadd.f32 %v912_v19, %v911_v17  ;;  %v1044_v17 = vld [vmem:[#allocation2 + $0x60] sm:$0xff] }
 0x309   :  { %v914_v26 = vpop.f32.mrf.mxu1 }
 0x30a   :  { %821 = vst [vmem:[#allocation10 + $0x10] sm:$0xff] %v805_v24  ;;  %v752_v27 = vadd.f32 %v913_v12, %v1401_v3 }
 0x30b   :  { %v915_v46 = vpop.f32.mrf.mxu1 }
 0x30c   :  { %v806_v45 = vadd.f32 %v1035_v28, %v752_v27  ;;  %v916_v31 = vadd.f32 %v915_v46, %v914_v26  ;;  %v1045_v26 = vld [vmem:[#allocation2 + $0x68] sm:$0xff] }
 0x30d   :  { %v917_v14 = vpop.f32.mrf.mxu1 }
 0x30e   :  { %822 = vst [vmem:[#allocation10 + $0x18] sm:$0xff] %v806_v45  ;;  %v757_v32 = vadd.f32 %v916_v31, %v1401_v3 }
 0x30f   :  { %v918_v33 = vpop.f32.mrf.mxu1 }
 0x310   :  { %v807_v35 = vadd.f32 %v1036_v34, %v757_v32  ;;  %v919_v22 = vadd.f32 %v918_v33, %v917_v14  ;;  %v1046_v14 = vld [vmem:[#allocation2 + $0x70] sm:$0xff] }
 0x311   :  { %v920_v39 = vpop.f32.mrf.mxu1 }
 0x312   :  { %823 = vst [vmem:[#allocation10 + $0x20] sm:$0xff] %v807_v35  ;;  %v760_v40 = vadd.f32 %v919_v22, %v1401_v3  ;;  %v1047_v35 = vld [vmem:[#allocation2 + $0x78] sm:$0xff] }
 0x313   :  { %v921_v41 = vpop.f32.mrf.mxu1 }
 0x314   :  { %v808_v29 = vadd.f32 %v1037_v56, %v760_v40  ;;  %v922_v55 = vadd.f32 %v921_v41, %v920_v39 }
 0x315   :  { %v923_v42 = vpop.f32.mrf.mxu1 }
 0x316   :  { %824 = vst [vmem:[#allocation10 + $0x28] sm:$0xff] %v808_v29  ;;  %v765_v43 = vadd.f32 %v922_v55, %v1401_v3 }
 0x317   :  { %v924_v44 = vpop.f32.mrf.mxu1 }
 0x318   :  { %v809_v48 = vadd.f32 %v1038_v47, %v765_v43  ;;  %v925_v49 = vadd.f32 %v924_v44, %v923_v42 }
 0x319   :  { %v926_v50 = vpop.f32.mrf.mxu1 }
 0x31a   :  { %825 = vst [vmem:[#allocation10 + $0x30] sm:$0xff] %v809_v48  ;;  %v768_v51 = vadd.f32 %v925_v49, %v1401_v3 }
 0x31b   :  { %v927_v1 = vpop.f32.mrf.mxu1 }
 0x31c   :  { %v810_v53 = vadd.f32 %v1039_v52, %v768_v51  ;;  %v928_v0 = vadd.f32 %v927_v1, %v926_v50 }
 0x31d   :  { %v929_v23 = vpop.f32.mrf.mxu1 }
 0x31e   :  { %826 = vst [vmem:[#allocation10 + $0x38] sm:$0xff] %v810_v53  ;;  %v773_v30 = vadd.f32 %v928_v0, %v1401_v3 }
 0x31f   :  { %v930_v54 = vpop.f32.mrf.mxu1 }
 0x320   :  { %v811_v58 = vadd.f32 %v1040_v57, %v773_v30  ;;  %v931_v11 = vadd.f32 %v930_v54, %v929_v23 }
 0x321   :  { %v932_v59 = vpop.f32.mrf.mxu1 }
 0x322   :  { %827 = vst [vmem:[#allocation10 + $0x40] sm:$0xff] %v811_v58  ;;  %v776_v60 = vadd.f32 %v931_v11, %v1401_v3 }
 0x323   :  { %v933_v10 = vpop.f32.mrf.mxu1 }
 0x324   :  { %v812_v62 = vadd.f32 %v1041_v61, %v776_v60  ;;  %v934_v63 = vadd.f32 %v933_v10, %v932_v59 }
 0x325   :  { %v935_v2 = vpop.f32.mrf.mxu1 }
 0x326   :  { %828 = vst [vmem:[#allocation10 + $0x48] sm:$0xff] %v812_v62  ;;  %v781_v13 = vadd.f32 %v934_v63, %v1401_v3 }
 0x327   :  { %v936_v4 = vpop.f32.mrf.mxu1 }
 0x328   :  { %v813_v9 = vadd.f32 %v1042_v25, %v781_v13  ;;  %v937_v5 = vadd.f32 %v936_v4, %v935_v2 }
 0x329   :  { %v938_v38 = vpop.f32.mrf.mxu1 }
 0x32a   :  { %829 = vst [vmem:[#allocation10 + $0x50] sm:$0xff] %v813_v9  ;;  %v784_v21 = vadd.f32 %v937_v5, %v1401_v3 }
 0x32b   :  { %v939_v8 = vpop.f32.mrf.mxu1 }
 0x32c   :  { %v814_v6 = vadd.f32 %v1043_v36, %v784_v21  ;;  %v940_v37 = vadd.f32 %v939_v8, %v938_v38 }
 0x32d   :  { %v941_v7 = vpop.f32.mrf.mxu1 }
 0x32e   :  { %830 = vst [vmem:[#allocation10 + $0x58] sm:$0xff] %v814_v6  ;;  %v789_v15 = vadd.f32 %v940_v37, %v1401_v3 }
 0x32f   :  { %v942_v16 = vpop.f32.mrf.mxu1 }
 0x330   :  { %v815_v18 = vadd.f32 %v1044_v17, %v789_v15  ;;  %v943_v19 = vadd.f32 %v942_v16, %v941_v7 }
 0x331   :  { %v944_v20 = vpop.f32.mrf.mxu1 }
 0x332   :  { %831 = vst [vmem:[#allocation10 + $0x60] sm:$0xff] %v815_v18  ;;  %v792_v24 = vadd.f32 %v943_v19, %v1401_v3 }
 0x333   :  { %v945_v12 = vpop.f32.mrf.mxu1 }
 0x334   :  { %v816_v27 = vadd.f32 %v1045_v26, %v792_v24  ;;  %v946_v46 = vadd.f32 %v945_v12, %v944_v20 }
 0x335   :  { %v947_v28 = vpop.f32.mrf.mxu1 }
 0x336   :  { %832 = vst [vmem:[#allocation10 + $0x68] sm:$0xff] %v816_v27  ;;  %v797_v45 = vadd.f32 %v946_v46, %v1401_v3 }
 0x337   :  { %v948_v31 = vpop.f32.mrf.mxu1 }
 0x338   :  { %v817_v32 = vadd.f32 %v1046_v14, %v797_v45  ;;  %v949_v33 = vadd.f32 %v948_v31, %v947_v28 }
 0x33a   :  { %833 = vst [vmem:[#allocation10 + $0x70] sm:$0xff] %v817_v32  ;;  %v800_v34 = vadd.f32 %v949_v33, %v1401_v3 }
 0x33c   :  { %v818_v22 = vadd.f32 %v1047_v35, %v800_v34 }
 0x33e   :  { %834 = vst [vmem:[#allocation10 + $0x78] sm:$0xff] %v818_v22 }
 0x33f   :  { %1139 = shalt.err (!%p1136_p10)
}
 0x340   :  { %846 = dma.vmem_to_hbm [thread:$0]  %s841_s3, 2048, %s1429_s4, [#allocation4], %s1158_s23, %s1158_s23, %s1159_s24  }
 0x341   :  { %1154 = dma.done.wait [#allocation4], 2048  }
 0x342   :  { %1155 = vsyncadd [#allocation4], 4294965248 }
 0x343   :  { %850 = vsyncpa [#allocation3], 1 }
 0x344   :  { %851 = vsyncpa [#allocation6], 1 }
 0x345   :  { %852 = vsyncpa [#allocation9], 1 }
 0x346   :  { %853 = vsyncpa [#allocation4], 1 }

</bundles_post_ra>
